<compile_context>
chip_gen: v7x
topology: tpu7x:2x2x1
jax: 0.10.0
libtpu: 0.0.40
codegen_flags: <defaults>
</compile_context>

<pallas_src>
import functools

import jax
import jax.numpy as jnp
from jax.experimental import pallas as pl
from jax.experimental.pallas import tpu as pltpu


def _dot(a, b):
    # Default matmul precision (bf16 MXU passes, f32 accumulation); the review
    # flagged HIGHEST-precision f32 matmuls as a v5e throughput tax.
    return jnp.dot(a, b, preferred_element_type=jnp.float32)


def _round_up(x, m):
    return (x + m - 1) // m * m


# ----------------------------------------------------------------------------
# Main kernel: one row tile (tm rows of the flattened N*P axis) per grid step.
# ----------------------------------------------------------------------------
def xconv_kernel(pts_ref, rep_ref, fts_ref,
                 w1_ref, b1_ref, w2_ref, b2_ref,
                 wxc_ref, bxc_ref, wx1_ref, bx1_ref,
                 wx2_ref, bx2_ref, wdbd_ref, wpt_ref,
                 bd_ref, wp_ref,
                 y_ref, stat_ref, *, rows_total):
    tm, co = y_ref.shape
    relu = lambda v: jnp.maximum(v, 0.0)

    # Local coordinates, flat [k*dims + d] lane layout (zero-padded to 128).
    ploc = pts_ref[...] - rep_ref[...]

    # dense1 / dense2 as block-diagonal matmuls.  dense2's output columns are
    # already laid out in the fts_cat layout [k*Cc + c], so concatenating the
    # input features is a plain add of the pre-embedded fts tensor.
    h1 = relu(_dot(ploc, w1_ref[...]) + b1_ref[...])                   # (tm, K*C_mid)
    fcat = relu(_dot(h1, w2_ref[...]) + b2_ref[...]) + fts_ref[...]    # (tm, K*Cc)

    # X-transform: the (1,K) conv over (K, dims) is a single matmul on the
    # K*dims-wide local-coordinate layout, then two KK x KK dense layers.
    t0 = relu(_dot(ploc, wxc_ref[...]) + bxc_ref[...])                 # (tm, KK)
    t1 = relu(_dot(t0, wx1_ref[...]) + bx1_ref[...])                   # (tm, KK)
    xt = _dot(t1, wx2_ref[...]) + bx2_ref[...]                         # (tm, KK), X in j-major order

    # fts_X = X @ fts_cat, depthwise (1,K) conv and pointwise 1x1 conv, fused:
    #   A_d[r, k*Cc + c]  = sum_i X[r, i, k] * Wd[c*dm+d, i]        (matmul)
    #   out[r, o]        += sum_{k,c} fcat[r,k*Cc+c] * A_d[...] * Wp[c*dm+d, o]
    # The depthwise bias folds into bd @ Wp.
    acc = _dot(bd_ref[...], wp_ref[...])                               # (1, co)
    for d in range(wdbd_ref.shape[0]):
        a_d = _dot(xt, wdbd_ref[d])                                    # (tm, K*Cc)
        acc = acc + _dot(fcat * a_d, wpt_ref[d])                       # (tm, co)
    y = relu(acc)
    y_ref[...] = y

    # Per-tile masked partial sum / sum-of-squares for the fused BatchNorm
    # (training-mode batch statistics); padded rows of the last tile excluded.
    row = jax.lax.broadcasted_iota(jnp.int32, (tm, 1), 0) + pl.program_id(0) * tm
    ym = jnp.where(row < rows_total, y, 0.0)
    psum = jnp.sum(ym, axis=0, keepdims=True)
    psq = jnp.sum(ym * ym, axis=0, keepdims=True)
    stat_ref[0] = jnp.concatenate(
        [psum, psq, jnp.zeros((6, co), jnp.float32)], axis=0)


# ----------------------------------------------------------------------------
# BatchNorm2d normalize pass (tiled; reads the tiny per-tile partials).
# ----------------------------------------------------------------------------
def bn_kernel(y_ref, stat_ref, g_ref, b_ref, o_ref, *, rows_total):
    tot = jnp.sum(stat_ref[...], axis=0)                # (8, co): row0=sum, row1=sumsq
    inv_n = jnp.float32(1.0 / rows_total)
    mean = tot[0:1, :] * inv_n
    var = jnp.maximum(tot[1:2, :] * inv_n - mean * mean, 0.0)
    scale = jax.lax.rsqrt(var + 1e-5) * g_ref[...]
    o_ref[...] = (y_ref[...] - mean) * scale + b_ref[...]


# ----------------------------------------------------------------------------
# Wrapper: row-tiling, lane padding and weight re-packing (pure layout glue).
# ----------------------------------------------------------------------------
@functools.partial(jax.jit, static_argnames=("depth_multiplier", "row_tile"))
def xconv_forward(rep_pt, pts, fts, params, depth_multiplier, row_tile=512):
    f32 = jnp.float32
    N, P, K, dims = pts.shape
    C_in = fts.shape[-1]
    C_mid = params["W1"].shape[-1]
    C_out = params["Wp"].shape[-1]
    Cc = C_mid + C_in
    KK = K * K
    dm = depth_multiplier

    R = N * P
    tm = max(8, 8 * (min(row_tile, _round_up(R, 8)) // 8))   # rows per tile (x8)
    n_tiles = -(-R // tm)
    R_pad = n_tiles * tm

    kd_pad = _round_up(K * dims, 128)     # lane width of local coords
    kcc_pad = _round_up(K * Cc, 128)      # lane width of fts_cat layout
    co_pad = _round_up(C_out, 128)        # lane width of the output

    # ---- activation re-layout (reshape / tile / zero-pad only) ----
    ptsf = jnp.pad(pts.reshape(R, K * dims),
                   ((0, R_pad - R), (0, kd_pad - K * dims)))
    repf = jnp.pad(jnp.tile(rep_pt.reshape(R, dims), (1, K)),
                   ((0, R_pad - R), (0, kd_pad - K * dims)))
    ftse = jnp.pad(fts, ((0, 0), (0, 0), (0, 0), (C_mid, 0))).reshape(R, K * Cc)
    ftse = jnp.pad(ftse, ((0, R_pad - R), (0, kcc_pad - K * Cc)))

    # ---- weight re-packing ----
    eyek = jnp.eye(K, dtype=f32)

    def blockdiag(w):                       # (A, B) -> (K*A, K*B) block-diagonal
        a, b = w.shape
        return (eyek[:, None, :, None] * w[None, :, None, :]).reshape(K * a, K * b)

    w1bd = jnp.pad(blockdiag(params["W1"]), ((0, kd_pad - K * dims), (0, 0)))
    b1t = jnp.tile(params["b1"], K)[None, :]

    w2e = blockdiag(jnp.pad(params["W2"], ((0, 0), (0, C_in))))
    w2e = jnp.pad(w2e, ((0, 0), (0, kcc_pad - K * Cc)))
    b2e = jnp.pad(jnp.tile(jnp.pad(params["b2"], (0, C_in)), K),
                  (0, kcc_pad - K * Cc))[None, :]

    wxc2 = jnp.pad(params["Wxc"].reshape(K * dims, KK),
                   ((0, kd_pad - K * dims), (0, 0)))
    bxc = params["bxc"][None, :]
    wx1 = params["Wx1"]
    bx1 = params["bx1"][None, :]
    # X produced in j-major ("transposed") order: X_t[:, j*K+i] = X[:, i, j].
    wx2t = params["Wx2"].reshape(KK, K, K).transpose(0, 2, 1).reshape(KK, KK)
    bx2t = params["bx2"].reshape(K, K).T.reshape(KK)[None, :]

    wd_r = params["Wd"].reshape(Cc, dm, K)          # [c, d, i] = Wd[c*dm+d, i]
    wp_r = params["Wp"].reshape(Cc, dm, C_out)      # [c, d, o] = Wp[c*dm+d, o]
    wdbd = jnp.stack([blockdiag(wd_r[:, d, :].T) for d in range(dm)], 0)
    wdbd = jnp.pad(wdbd, ((0, 0), (0, 0), (0, kcc_pad - K * Cc)))
    wptile = jnp.stack([jnp.tile(wp_r[:, d, :], (K, 1)) for d in range(dm)], 0)
    wptile = jnp.pad(wptile,
                     ((0, 0), (0, kcc_pad - K * Cc), (0, co_pad - C_out)))
    bd_row = params["bd"][None, :]
    wp_full = jnp.pad(params["Wp"], ((0, 0), (0, co_pad - C_out)))
    gamma = jnp.pad(params["gamma"], (0, co_pad - C_out))[None, :]
    beta = jnp.pad(params["beta"], (0, co_pad - C_out))[None, :]

    operands = (ptsf, repf, ftse,
                w1bd, b1t, w2e, b2e,
                wxc2, bxc, wx1, bx1,
                wx2t, bx2t, wdbd, wptile,
                bd_row, wp_full)

    def _row_spec(lanes):
        return pl.BlockSpec((tm, lanes), lambda t: (t, 0))

    def _const_spec(arr):
        return pl.BlockSpec(arr.shape, lambda t, _nd=arr.ndim: (0,) * _nd)

    in_specs = [_row_spec(kd_pad), _row_spec(kd_pad), _row_spec(kcc_pad)]
    in_specs += [_const_spec(w) for w in operands[3:]]

    cparams = pltpu.CompilerParams(
        dimension_semantics=("parallel",),
        # Explicit scoped-VMEM budget; keep <= ~48 MiB when sizing row tiles
        # for v7x (64 MiB physical).
        vmem_limit_bytes=32 * 1024 * 1024,
    )

    y, stats = pl.pallas_call(
        functools.partial(xconv_kernel, rows_total=R),
        out_shape=(jax.ShapeDtypeStruct((R_pad, co_pad), f32),
                   jax.ShapeDtypeStruct((n_tiles, 8, co_pad), f32)),
        grid=(n_tiles,),
        in_specs=in_specs,
        out_specs=(pl.BlockSpec((tm, co_pad), lambda t: (t, 0)),
                   pl.BlockSpec((1, 8, co_pad), lambda t: (t, 0, 0))),
        compiler_params=cparams,
    )(*operands)

    ybn = pl.pallas_call(
        functools.partial(bn_kernel, rows_total=R),
        out_shape=jax.ShapeDtypeStruct((R_pad, co_pad), f32),
        grid=(n_tiles,),
        in_specs=[pl.BlockSpec((tm, co_pad), lambda t: (t, 0)),
                  _const_spec(stats),
                  _const_spec(gamma),
                  _const_spec(beta)],
        out_specs=pl.BlockSpec((tm, co_pad), lambda t: (t, 0)),
        compiler_params=cparams,
    )(y, stats, gamma, beta)

    return ybn[:R, :C_out].reshape(N, P, C_out)


# ----------------------------------------------------------------------------
# Pure-JAX reference (mirrors the PyTorch forward, canonical parameter layouts).
# ----------------------------------------------------------------------------
def xconv_ref(rep_pt, pts, fts, p, dm):
    N, P, K, _ = pts.shape
    relu = jax.nn.relu
    pts_local = pts - rep_pt[:, :, None, :]
    h1 = relu(pts_local @ p["W1"] + p["b1"])
    h2 = relu(h1 @ p["W2"] + p["b2"])
    fts_cat = jnp.concatenate([h2, fts], axis=-1)
    t0 = relu(jnp.einsum("npkc,kco->npo", pts_local, p["Wxc"]) + p["bxc"])
    t1 = relu(t0 @ p["Wx1"] + p["bx1"])
    t2 = t1 @ p["Wx2"] + p["bx2"]
    X = t2.reshape(N, P, K, K)
    fts_X = jnp.einsum("npij,npjc->npic", X, fts_cat)
    fts_g = jnp.repeat(fts_X, dm, axis=-1)          # depthwise out j reads in j//dm
    mid = jnp.einsum("npkj,jk->npj", fts_g, p["Wd"]) + p["bd"]
    out = relu(mid @ p["Wp"])                       # pointwise conv (no bias) + ReLU
    mean = out.mean(axis=(0, 1), keepdims=True)
    var = ((out - mean) ** 2).mean(axis=(0, 1), keepdims=True)
    return (out - mean) / jnp.sqrt(var + 1e-5) * p["gamma"] + p["beta"]


def init_params(key, dims, K, C_in, C_mid, C_out, dm):
    KK = K * K
    Cc = C_mid + C_in
    Cdm = Cc * dm
    ks = jax.random.split(key, 15)
    n = lambda k, shape, s: (s * jax.random.normal(k, shape)).astype(jnp.float32)
    return dict(
        W1=n(ks[0], (dims, C_mid), 0.5), b1=n(ks[1], (C_mid,), 0.1),
        W2=n(ks[2], (C_mid, C_mid), 0.5), b2=n(ks[3], (C_mid,), 0.1),
        Wxc=n(ks[4], (K, dims, KK), 0.3), bxc=n(ks[5], (KK,), 0.1),
        Wx1=n(ks[6], (KK, KK), 0.2), bx1=n(ks[7], (KK,), 0.1),
        Wx2=n(ks[8], (KK, KK), 0.2), bx2=n(ks[9], (KK,), 0.1),
        Wd=n(ks[10], (Cdm, K), 0.3), bd=n(ks[11], (Cdm,), 0.1),
        Wp=n(ks[12], (Cdm, C_out), 0.3),
        gamma=(1.0 + n(ks[13], (C_out,), 0.1)), beta=n(ks[14], (C_out,), 0.1),
    )


if __name__ == "__main__":
    def run_case(key, N, P, K, dims, C_in, C_mid, C_out, dm, row_tile):
        k1, k2, k3, kp = jax.random.split(key, 4)
        rep_pt = jax.random.normal(k1, (N, P, dims), jnp.float32)
        pts = jax.random.normal(k2, (N, P, K, dims), jnp.float32)
        fts = jax.random.normal(k3, (N, P, K, C_in), jnp.float32)
        params = init_params(kp, dims, K, C_in, C_mid, C_out, dm)

        out = jax.block_until_ready(
            xconv_forward(rep_pt, pts, fts, params,
                          depth_multiplier=dm, row_tile=row_tile))
        ref = xconv_ref(rep_pt, pts, fts, params, dm)

        assert out.shape == (N, P, C_out)
        assert bool(jnp.all(jnp.isfinite(out)))
        # Default (bf16-pass) matmul precision on both sides plus a different
        # (algebraically identical) contraction order in the kernel => compare
        # with a correspondingly sized tolerance.
        assert bool(jnp.allclose(out, ref, rtol=5e-2, atol=5e-2)), float(
            jnp.max(jnp.abs(out - ref)))

    key = jax.random.PRNGKey(0)
    ka, kb = jax.random.split(key)
    # PointNetfeat's pcnn2 X-Conv shapes: N*P = 240 rows -> 4 row tiles of 64
    # (last tile partially padded, exercising the BN row mask).
    run_case(ka, N=20, P=12, K=5, dims=5, C_in=32, C_mid=16, C_out=64, dm=1,
             row_tile=64)
    # Small config exercising depth_multiplier > 1 and a 2-step grid.
    run_case(kb, N=2, P=8, K=8, dims=3, C_in=4, C_mid=8, C_out=16, dm=2,
             row_tile=8)
    print("KERNEL_OK")
</pallas_src>

<mosaic_0001>
module attributes {stable_mosaic.version = 11 : i64} {
  func.func @bn_kernel(%arg0: i32, %arg1: memref<64x128xf32, #tpu.memory_space<vmem>>, %arg2: memref<4x8x128xf32, #tpu.memory_space<vmem>>, %arg3: memref<1x128xf32, #tpu.memory_space<vmem>>, %arg4: memref<1x128xf32, #tpu.memory_space<vmem>>, %arg5: memref<64x128xf32, #tpu.memory_space<vmem>>) attributes {dimension_semantics = [#tpu.dimension_semantics<parallel>], iteration_bounds = array<i64: 4>, scalar_prefetch = 0 : i64, scratch_operands = 0 : i64, tpu.core_type = #tpu.core_type<tc>, window_params = [{transform_indices = @transform_0, window_bounds = array<i64: 64, 128>}, {pipeline_mode = #tpu.pipeline_mode<synchronous>, transform_indices = @transform_1, window_bounds = array<i64: 4, 8, 128>}, {pipeline_mode = #tpu.pipeline_mode<synchronous>, transform_indices = @transform_2, window_bounds = array<i64: 1, 128>}, {pipeline_mode = #tpu.pipeline_mode<synchronous>, transform_indices = @transform_3, window_bounds = array<i64: 1, 128>}, {transform_indices = @transform_4, window_bounds = array<i64: 64, 128>}]} {
    %c0 = arith.constant 0 : index
    %c0_0 = arith.constant 0 : index
    %c0_1 = arith.constant 0 : index
    %0 = vector.load %arg2[%c0, %c0_0, %c0_1] : memref<4x8x128xf32, #tpu.memory_space<vmem>>, vector<4x8x128xf32>
    %cst = arith.constant dense<0.000000e+00> : vector<8x128xf32>
    %1 = vector.multi_reduction <add>, %0, %cst [0] : vector<4x8x128xf32> to vector<8x128xf32>
    %2 = vector.extract_strided_slice %1 {offsets = [0, 0], sizes = [1, 128], strides = [1, 1]} : vector<8x128xf32> to vector<1x128xf32>
    %cst_2 = arith.constant 0.00416666688 : f32
    %3 = vector.broadcast %cst_2 : f32 to vector<1x128xf32>
    %4 = arith.mulf %2, %3 : vector<1x128xf32>
    %5 = vector.extract_strided_slice %1 {offsets = [1, 0], sizes = [1, 128], strides = [1, 1]} : vector<8x128xf32> to vector<1x128xf32>
    %cst_3 = arith.constant 0.00416666688 : f32
    %6 = vector.broadcast %cst_3 : f32 to vector<1x128xf32>
    %7 = arith.mulf %5, %6 : vector<1x128xf32>
    %8 = arith.mulf %4, %4 : vector<1x128xf32>
    %9 = arith.subf %7, %8 : vector<1x128xf32>
    %cst_4 = arith.constant 0.000000e+00 : f32
    %10 = vector.broadcast %cst_4 : f32 to vector<1x128xf32>
    %11 = arith.maximumf %9, %10 : vector<1x128xf32>
    %cst_5 = arith.constant 9.99999974E-6 : f32
    %12 = vector.broadcast %cst_5 : f32 to vector<1x128xf32>
    %13 = arith.addf %11, %12 : vector<1x128xf32>
    %14 = math.rsqrt %13 : vector<1x128xf32>
    %c0_6 = arith.constant 0 : index
    %c0_7 = arith.constant 0 : index
    %15 = vector.load %arg3[%c0_6, %c0_7] : memref<1x128xf32, #tpu.memory_space<vmem>>, vector<1x128xf32>
    %16 = arith.mulf %14, %15 : vector<1x128xf32>
    %c0_8 = arith.constant 0 : index
    %c0_9 = arith.constant 0 : index
    %17 = vector.load %arg1[%c0_8, %c0_9] : memref<64x128xf32, #tpu.memory_space<vmem>>, vector<64x128xf32>
    %18 = vector.broadcast %4 : vector<1x128xf32> to vector<64x128xf32>
    %19 = arith.subf %17, %18 : vector<64x128xf32>
    %20 = vector.broadcast %16 : vector<1x128xf32> to vector<64x128xf32>
    %21 = arith.mulf %19, %20 : vector<64x128xf32>
    %c0_10 = arith.constant 0 : index
    %c0_11 = arith.constant 0 : index
    %22 = vector.load %arg4[%c0_10, %c0_11] : memref<1x128xf32, #tpu.memory_space<vmem>>, vector<1x128xf32>
    %23 = vector.broadcast %22 : vector<1x128xf32> to vector<64x128xf32>
    %24 = arith.addf %21, %23 : vector<64x128xf32>
    %c0_12 = arith.constant 0 : index
    %c0_13 = arith.constant 0 : index
    %25 = vector.load %arg5[%c0_12, %c0_13] : memref<64x128xf32, #tpu.memory_space<vmem>>, vector<64x128xf32>
    tpu.vector_store %arg5[%c0_12, %c0_13], %24 {strides = array<i32>} : memref<64x128xf32, #tpu.memory_space<vmem>>, vector<64x128xf32>,
    return
  }
  func.func @transform_0(%arg0: i32) -> (i32, i32) {
    %c0_i32 = arith.constant 0 : i32
    %c0_i32_0 = arith.constant 0 : i32
    return %arg0, %c0_i32 : i32, i32
  }
  func.func @transform_1(%arg0: i32) -> (i32, i32, i32) {
    %c0_i32 = arith.constant 0 : i32
    %c0_i32_0 = arith.constant 0 : i32
    %c0_i32_1 = arith.constant 0 : i32
    %c0_i32_2 = arith.constant 0 : i32
    return %c0_i32, %c0_i32_0, %c0_i32_1 : i32, i32, i32
  }
  func.func @transform_2(%arg0: i32) -> (i32, i32) {
    %c0_i32 = arith.constant 0 : i32
    %c0_i32_0 = arith.constant 0 : i32
    %c0_i32_1 = arith.constant 0 : i32
    return %c0_i32, %c0_i32_0 : i32, i32
  }
  func.func @transform_3(%arg0: i32) -> (i32, i32) {
    %c0_i32 = arith.constant 0 : i32
    %c0_i32_0 = arith.constant 0 : i32
    %c0_i32_1 = arith.constant 0 : i32
    return %c0_i32, %c0_i32_0 : i32, i32
  }
  func.func @transform_4(%arg0: i32) -> (i32, i32) {
    %c0_i32 = arith.constant 0 : i32
    %c0_i32_0 = arith.constant 0 : i32
    return %arg0, %c0_i32 : i32, i32
  }
}

module attributes {stable_mosaic.version = 11 : i64} {
  func.func @xconv_kernel(%arg0: i32, %arg1: memref<64x128xf32, #tpu.memory_space<vmem>>, %arg2: memref<64x128xf32, #tpu.memory_space<vmem>>, %arg3: memref<64x256xf32, #tpu.memory_space<vmem>>, %arg4: memref<128x80xf32, #tpu.memory_space<vmem>>, %arg5: memref<1x80xf32, #tpu.memory_space<vmem>>, %arg6: memref<80x256xf32, #tpu.memory_space<vmem>>, %arg7: memref<1x256xf32, #tpu.memory_space<vmem>>, %arg8: memref<128x25xf32, #tpu.memory_space<vmem>>, %arg9: memref<1x25xf32, #tpu.memory_space<vmem>>, %arg10: memref<25x25xf32, #tpu.memory_space<vmem>>, %arg11: memref<1x25xf32, #tpu.memory_space<vmem>>, %arg12: memref<25x25xf32, #tpu.memory_space<vmem>>, %arg13: memref<1x25xf32, #tpu.memory_space<vmem>>, %arg14: memref<1x25x256xf32, #tpu.memory_space<vmem>>, %arg15: memref<1x256x128xf32, #tpu.memory_space<vmem>>, %arg16: memref<1x48xf32, #tpu.memory_space<vmem>>, %arg17: memref<48x128xf32, #tpu.memory_space<vmem>>, %arg18: memref<64x128xf32, #tpu.memory_space<vmem>>, %arg19: memref<1x8x128xf32, #tpu.memory_space<vmem>>) attributes {dimension_semantics = [#tpu.dimension_semantics<parallel>], iteration_bounds = array<i64: 4>, scalar_prefetch = 0 : i64, scratch_operands = 0 : i64, tpu.core_type = #tpu.core_type<tc>, window_params = [{transform_indices = @transform_0, window_bounds = array<i64: 64, 128>}, {transform_indices = @transform_1, window_bounds = array<i64: 64, 128>}, {transform_indices = @transform_2, window_bounds = array<i64: 64, 256>}, {pipeline_mode = #tpu.pipeline_mode<synchronous>, transform_indices = @transform_3, window_bounds = array<i64: 128, 80>}, {pipeline_mode = #tpu.pipeline_mode<synchronous>, transform_indices = @transform_4, window_bounds = array<i64: 1, 80>}, {pipeline_mode = #tpu.pipeline_mode<synchronous>, transform_indices = @transform_5, window_bounds = array<i64: 80, 256>}, {pipeline_mode = #tpu.pipeline_mode<synchronous>, transform_indices = @transform_6, window_bounds = array<i64: 1, 256>}, {pipeline_mode = #tpu.pipeline_mode<synchronous>, transform_indices = @transform_7, window_bounds = array<i64: 128, 25>}, {pipeline_mode = #tpu.pipeline_mode<synchronous>, transform_indices = @transform_8, window_bounds = array<i64: 1, 25>}, {pipeline_mode = #tpu.pipeline_mode<synchronous>, transform_indices = @transform_9, window_bounds = array<i64: 25, 25>}, {pipeline_mode = #tpu.pipeline_mode<synchronous>, transform_indices = @transform_10, window_bounds = array<i64: 1, 25>}, {pipeline_mode = #tpu.pipeline_mode<synchronous>, transform_indices = @transform_11, window_bounds = array<i64: 25, 25>}, {pipeline_mode = #tpu.pipeline_mode<synchronous>, transform_indices = @transform_12, window_bounds = array<i64: 1, 25>}, {pipeline_mode = #tpu.pipeline_mode<synchronous>, transform_indices = @transform_13, window_bounds = array<i64: 1, 25, 256>}, {pipeline_mode = #tpu.pipeline_mode<synchronous>, transform_indices = @transform_14, window_bounds = array<i64: 1, 256, 128>}, {pipeline_mode = #tpu.pipeline_mode<synchronous>, transform_indices = @transform_15, window_bounds = array<i64: 1, 48>}, {pipeline_mode = #tpu.pipeline_mode<synchronous>, transform_indices = @transform_16, window_bounds = array<i64: 48, 128>}, {transform_indices = @transform_17, window_bounds = array<i64: 64, 128>}, {transform_indices = @transform_18, window_bounds = array<i64: 1, 8, 128>}]} {
    %c0 = arith.constant 0 : index
    %c0_0 = arith.constant 0 : index
    %0 = vector.load %arg1[%c0, %c0_0] : memref<64x128xf32, #tpu.memory_space<vmem>>, vector<64x128xf32>
    %c0_1 = arith.constant 0 : index
    %c0_2 = arith.constant 0 : index
    %1 = vector.load %arg2[%c0_1, %c0_2] : memref<64x128xf32, #tpu.memory_space<vmem>>, vector<64x128xf32>
    %2 = arith.subf %0, %1 : vector<64x128xf32>
    %c0_3 = arith.constant 0 : index
    %c0_4 = arith.constant 0 : index
    %3 = vector.load %arg4[%c0_3, %c0_4] : memref<128x80xf32, #tpu.memory_space<vmem>>, vector<128x80xf32>
    %cst = arith.constant dense<0.000000e+00> : vector<64x80xf32>
    %4 = tpu.matmul %2, %3, %cst {dimension_numbers = #tpu.dot_dimension_numbers<[1], [0], [0], [1], [0, 0, 1, 1], [], []>} : vector<64x128xf32>, vector<128x80xf32>, vector<64x80xf32> -> vector<64x80xf32>
    %c0_5 = arith.constant 0 : index
    %c0_6 = arith.constant 0 : index
    %5 = vector.load %arg5[%c0_5, %c0_6] : memref<1x80xf32, #tpu.memory_space<vmem>>, vector<1x80xf32>
    %6 = vector.broadcast %5 : vector<1x80xf32> to vector<64x80xf32>
    %7 = arith.addf %4, %6 : vector<64x80xf32>
    %cst_7 = arith.constant 0.000000e+00 : f32
    %8 = vector.broadcast %cst_7 : f32 to vector<64x80xf32>
    %9 = arith.maximumf %7, %8 : vector<64x80xf32>
    %c0_8 = arith.constant 0 : index
    %c0_9 = arith.constant 0 : index
    %10 = vector.load %arg6[%c0_8, %c0_9] : memref<80x256xf32, #tpu.memory_space<vmem>>, vector<80x256xf32>
    %cst_10 = arith.constant dense<0.000000e+00> : vector<64x256xf32>
    %11 = tpu.matmul %9, %10, %cst_10 {dimension_numbers = #tpu.dot_dimension_numbers<[1], [0], [0], [1], [0, 0, 1, 1], [], []>} : vector<64x80xf32>, vector<80x256xf32>, vector<64x256xf32> -> vector<64x256xf32>
    %c0_11 = arith.constant 0 : index
    %c0_12 = arith.constant 0 : index
    %12 = vector.load %arg7[%c0_11, %c0_12] : memref<1x256xf32, #tpu.memory_space<vmem>>, vector<1x256xf32>
    %13 = vector.broadcast %12 : vector<1x256xf32> to vector<64x256xf32>
    %14 = arith.addf %11, %13 : vector<64x256xf32>
    %cst_13 = arith.constant 0.000000e+00 : f32
    %15 = vector.broadcast %cst_13 : f32 to vector<64x256xf32>
    %16 = arith.maximumf %14, %15 : vector<64x256xf32>
    %c0_14 = arith.constant 0 : index
    %c0_15 = arith.constant 0 : index
    %17 = vector.load %arg3[%c0_14, %c0_15] : memref<64x256xf32, #tpu.memory_space<vmem>>, vector<64x256xf32>
    %18 = arith.addf %16, %17 : vector<64x256xf32>
    %c0_16 = arith.constant 0 : index
    %c0_17 = arith.constant 0 : index
    %19 = vector.load %arg8[%c0_16, %c0_17] : memref<128x25xf32, #tpu.memory_space<vmem>>, vector<128x25xf32>
    %cst_18 = arith.constant dense<0.000000e+00> : vector<64x25xf32>
    %20 = tpu.matmul %2, %19, %cst_18 {dimension_numbers = #tpu.dot_dimension_numbers<[1], [0], [0], [1], [0, 0, 1, 1], [], []>} : vector<64x128xf32>, vector<128x25xf32>, vector<64x25xf32> -> vector<64x25xf32>
    %c0_19 = arith.constant 0 : index
    %c0_20 = arith.constant 0 : index
    %21 = vector.load %arg9[%c0_19, %c0_20] : memref<1x25xf32, #tpu.memory_space<vmem>>, vector<1x25xf32>
    %22 = vector.broadcast %21 : vector<1x25xf32> to vector<64x25xf32>
    %23 = arith.addf %20, %22 : vector<64x25xf32>
    %cst_21 = arith.constant 0.000000e+00 : f32
    %24 = vector.broadcast %cst_21 : f32 to vector<64x25xf32>
    %25 = arith.maximumf %23, %24 : vector<64x25xf32>
    %c0_22 = arith.constant 0 : index
    %c0_23 = arith.constant 0 : index
    %26 = vector.load %arg10[%c0_22, %c0_23] : memref<25x25xf32, #tpu.memory_space<vmem>>, vector<25x25xf32>
    %cst_24 = arith.constant dense<0.000000e+00> : vector<64x25xf32>
    %27 = tpu.matmul %25, %26, %cst_24 {dimension_numbers = #tpu.dot_dimension_numbers<[1], [0], [0], [1], [0, 0, 1, 1], [], []>} : vector<64x25xf32>, vector<25x25xf32>, vector<64x25xf32> -> vector<64x25xf32>
    %c0_25 = arith.constant 0 : index
    %c0_26 = arith.constant 0 : index
    %28 = vector.load %arg11[%c0_25, %c0_26] : memref<1x25xf32, #tpu.memory_space<vmem>>, vector<1x25xf32>
    %29 = vector.broadcast %28 : vector<1x25xf32> to vector<64x25xf32>
    %30 = arith.addf %27, %29 : vector<64x25xf32>
    %cst_27 = arith.constant 0.000000e+00 : f32
    %31 = vector.broadcast %cst_27 : f32 to vector<64x25xf32>
    %32 = arith.maximumf %30, %31 : vector<64x25xf32>
    %c0_28 = arith.constant 0 : index
    %c0_29 = arith.constant 0 : index
    %33 = vector.load %arg12[%c0_28, %c0_29] : memref<25x25xf32, #tpu.memory_space<vmem>>, vector<25x25xf32>
    %cst_30 = arith.constant dense<0.000000e+00> : vector<64x25xf32>
    %34 = tpu.matmul %32, %33, %cst_30 {dimension_numbers = #tpu.dot_dimension_numbers<[1], [0], [0], [1], [0, 0, 1, 1], [], []>} : vector<64x25xf32>, vector<25x25xf32>, vector<64x25xf32> -> vector<64x25xf32>
    %c0_31 = arith.constant 0 : index
    %c0_32 = arith.constant 0 : index
    %35 = vector.load %arg13[%c0_31, %c0_32] : memref<1x25xf32, #tpu.memory_space<vmem>>, vector<1x25xf32>
    %36 = vector.broadcast %35 : vector<1x25xf32> to vector<64x25xf32>
    %37 = arith.addf %34, %36 : vector<64x25xf32>
    %c0_33 = arith.constant 0 : index
    %c0_34 = arith.constant 0 : index
    %38 = vector.load %arg16[%c0_33, %c0_34] : memref<1x48xf32, #tpu.memory_space<vmem>>, vector<1x48xf32>
    %c0_35 = arith.constant 0 : index
    %c0_36 = arith.constant 0 : index
    %39 = vector.load %arg17[%c0_35, %c0_36] : memref<48x128xf32, #tpu.memory_space<vmem>>, vector<48x128xf32>
    %cst_37 = arith.constant dense<0.000000e+00> : vector<1x128xf32>
    %40 = tpu.matmul %38, %39, %cst_37 {dimension_numbers = #tpu.dot_dimension_numbers<[1], [0], [0], [1], [0, 0, 1, 1], [], []>} : vector<1x48xf32>, vector<48x128xf32>, vector<1x128xf32> -> vector<1x128xf32>
    %c0_38 = arith.constant 0 : index
    %c0_39 = arith.constant 0 : index
    %c0_40 = arith.constant 0 : index
    %41 = vector.load %arg14[%c0_38, %c0_39, %c0_40] : memref<1x25x256xf32, #tpu.memory_space<vmem>>, vector<1x25x256xf32>
    %42 = vector.shape_cast %41 : vector<1x25x256xf32> to vector<25x256xf32>
    %cst_41 = arith.constant dense<0.000000e+00> : vector<64x256xf32>
    %43 = tpu.matmul %37, %42, %cst_41 {dimension_numbers = #tpu.dot_dimension_numbers<[1], [0], [0], [1], [0, 0, 1, 1], [], []>} : vector<64x25xf32>, vector<25x256xf32>, vector<64x256xf32> -> vector<64x256xf32>
    %44 = arith.mulf %18, %43 : vector<64x256xf32>
    %c0_42 = arith.constant 0 : index
    %c0_43 = arith.constant 0 : index
    %c0_44 = arith.constant 0 : index
    %45 = vector.load %arg15[%c0_42, %c0_43, %c0_44] : memref<1x256x128xf32, #tpu.memory_space<vmem>>, vector<1x256x128xf32>
    %46 = vector.shape_cast %45 : vector<1x256x128xf32> to vector<256x128xf32>
    %cst_45 = arith.constant dense<0.000000e+00> : vector<64x128xf32>
    %47 = tpu.matmul %44, %46, %cst_45 {dimension_numbers = #tpu.dot_dimension_numbers<[1], [0], [0], [1], [0, 0, 1, 1], [], []>} : vector<64x256xf32>, vector<256x128xf32>, vector<64x128xf32> -> vector<64x128xf32>
    %48 = vector.broadcast %40 : vector<1x128xf32> to vector<64x128xf32>
    %49 = arith.addf %48, %47 : vector<64x128xf32>
    %cst_46 = arith.constant 0.000000e+00 : f32
    %50 = vector.broadcast %cst_46 : f32 to vector<64x128xf32>
    %51 = arith.maximumf %49, %50 : vector<64x128xf32>
    %c0_47 = arith.constant 0 : index
    %c0_48 = arith.constant 0 : index
    %52 = vector.load %arg18[%c0_47, %c0_48] : memref<64x128xf32, #tpu.memory_space<vmem>>, vector<64x128xf32>
    tpu.vector_store %arg18[%c0_47, %c0_48], %51 {strides = array<i32>} : memref<64x128xf32, #tpu.memory_space<vmem>>, vector<64x128xf32>,
    %53 = tpu.iota {dimensions = array<i32: 0>} : vector<64x1xi32>
    %c64_i32 = arith.constant 64 : i32
    %54 = arith.muli %arg0, %c64_i32 : i32
    %55 = vector.broadcast %54 : i32 to vector<64x1xi32>
    %56 = arith.addi %53, %55 : vector<64x1xi32>
    %c240_i32 = arith.constant 240 : i32
    %57 = vector.broadcast %c240_i32 : i32 to vector<64x1xi32>
    %58 = arith.cmpi slt, %56, %57 : vector<64x1xi32>
    %cst_49 = arith.constant 0.000000e+00 : f32
    %59 = vector.shape_cast %58 : vector<64x1xi1> to vector<64x1xi1>
    %60 = vector.broadcast %59 : vector<64x1xi1> to vector<64x128xi1>
    %61 = vector.broadcast %cst_49 : f32 to vector<64x128xf32>
    %62 = arith.select %60, %51, %61 : vector<64x128xi1>, vector<64x128xf32>
    %cst_50 = arith.constant dense<0.000000e+00> : vector<128xf32>
    %63 = vector.multi_reduction <add>, %62, %cst_50 [0] : vector<64x128xf32> to vector<128xf32>
    %64 = vector.shape_cast %63 : vector<128xf32> to vector<1x128xf32>
    %65 = arith.mulf %62, %62 : vector<64x128xf32>
    %cst_51 = arith.constant dense<0.000000e+00> : vector<128xf32>
    %66 = vector.multi_reduction <add>, %65, %cst_51 [0] : vector<64x128xf32> to vector<128xf32>
    %67 = vector.shape_cast %66 : vector<128xf32> to vector<1x128xf32>
    %cst_52 = arith.constant 0.000000e+00 : f32
    %68 = vector.broadcast %cst_52 : f32 to vector<6x128xf32>
    %69 = tpu.concatenate %64, %67, %68 in 0 : vector<1x128xf32>, vector<1x128xf32>, vector<6x128xf32> -> vector<8x128xf32>
    %c0_53 = arith.constant 0 : index
    %c0_54 = arith.constant 0 : index
    %c0_55 = arith.constant 0 : index
    %70 = vector.load %arg19[%c0_53, %c0_54, %c0_55] : memref<1x8x128xf32, #tpu.memory_space<vmem>>, vector<1x8x128xf32>
    %71 = vector.shape_cast %70 : vector<1x8x128xf32> to vector<8x128xf32>
    %72 = vector.shape_cast %69 : vector<8x128xf32> to vector<1x8x128xf32>
    tpu.vector_store %arg19[%c0_53, %c0_54, %c0_55], %72 {strides = array<i32>} : memref<1x8x128xf32, #tpu.memory_space<vmem>>, vector<1x8x128xf32>,
    return
  }
  func.func @transform_0(%arg0: i32) -> (i32, i32) {
    %c0_i32 = arith.constant 0 : i32
    %c0_i32_0 = arith.constant 0 : i32
    return %arg0, %c0_i32 : i32, i32
  }
  func.func @transform_1(%arg0: i32) -> (i32, i32) {
    %c0_i32 = arith.constant 0 : i32
    %c0_i32_0 = arith.constant 0 : i32
    return %arg0, %c0_i32 : i32, i32
  }
  func.func @transform_2(%arg0: i32) -> (i32, i32) {
    %c0_i32 = arith.constant 0 : i32
    %c0_i32_0 = arith.constant 0 : i32
    return %arg0, %c0_i32 : i32, i32
  }
  func.func @transform_3(%arg0: i32) -> (i32, i32) {
    %c0_i32 = arith.constant 0 : i32
    %c0_i32_0 = arith.constant 0 : i32
    %c0_i32_1 = arith.constant 0 : i32
    return %c0_i32, %c0_i32_0 : i32, i32
  }
  func.func @transform_4(%arg0: i32) -> (i32, i32) {
    %c0_i32 = arith.constant 0 : i32
    %c0_i32_0 = arith.constant 0 : i32
    %c0_i32_1 = arith.constant 0 : i32
    return %c0_i32, %c0_i32_0 : i32, i32
  }
  func.func @transform_5(%arg0: i32) -> (i32, i32) {
    %c0_i32 = arith.constant 0 : i32
    %c0_i32_0 = arith.constant 0 : i32
    %c0_i32_1 = arith.constant 0 : i32
    return %c0_i32, %c0_i32_0 : i32, i32
  }
  func.func @transform_6(%arg0: i32) -> (i32, i32) {
    %c0_i32 = arith.constant 0 : i32
    %c0_i32_0 = arith.constant 0 : i32
    %c0_i32_1 = arith.constant 0 : i32
    return %c0_i32, %c0_i32_0 : i32, i32
  }
  func.func @transform_7(%arg0: i32) -> (i32, i32) {
    %c0_i32 = arith.constant 0 : i32
    %c0_i32_0 = arith.constant 0 : i32
    %c0_i32_1 = arith.constant 0 : i32
    return %c0_i32, %c0_i32_0 : i32, i32
  }
  func.func @transform_8(%arg0: i32) -> (i32, i32) {
    %c0_i32 = arith.constant 0 : i32
    %c0_i32_0 = arith.constant 0 : i32
    %c0_i32_1 = arith.constant 0 : i32
    return %c0_i32, %c0_i32_0 : i32, i32
  }
  func.func @transform_9(%arg0: i32) -> (i32, i32) {
    %c0_i32 = arith.constant 0 : i32
    %c0_i32_0 = arith.constant 0 : i32
    %c0_i32_1 = arith.constant 0 : i32
    return %c0_i32, %c0_i32_0 : i32, i32
  }
  func.func @transform_10(%arg0: i32) -> (i32, i32) {
    %c0_i32 = arith.constant 0 : i32
    %c0_i32_0 = arith.constant 0 : i32
    %c0_i32_1 = arith.constant 0 : i32
    return %c0_i32, %c0_i32_0 : i32, i32
  }
  func.func @transform_11(%arg0: i32) -> (i32, i32) {
    %c0_i32 = arith.constant 0 : i32
    %c0_i32_0 = arith.constant 0 : i32
    %c0_i32_1 = arith.constant 0 : i32
    return %c0_i32, %c0_i32_0 : i32, i32
  }
  func.func @transform_12(%arg0: i32) -> (i32, i32) {
    %c0_i32 = arith.constant 0 : i32
    %c0_i32_0 = arith.constant 0 : i32
    %c0_i32_1 = arith.constant 0 : i32
    return %c0_i32, %c0_i32_0 : i32, i32
  }
  func.func @transform_13(%arg0: i32) -> (i32, i32, i32) {
    %c0_i32 = arith.constant 0 : i32
    %c0_i32_0 = arith.constant 0 : i32
    %c0_i32_1 = arith.constant 0 : i32
    %c0_i32_2 = arith.constant 0 : i32
    return %c0_i32, %c0_i32_0, %c0_i32_1 : i32, i32, i32
  }
  func.func @transform_14(%arg0: i32) -> (i32, i32, i32) {
    %c0_i32 = arith.constant 0 : i32
    %c0_i32_0 = arith.constant 0 : i32
    %c0_i32_1 = arith.constant 0 : i32
    %c0_i32_2 = arith.constant 0 : i32
    return %c0_i32, %c0_i32_0, %c0_i32_1 : i32, i32, i32
  }
  func.func @transform_15(%arg0: i32) -> (i32, i32) {
    %c0_i32 = arith.constant 0 : i32
    %c0_i32_0 = arith.constant 0 : i32
    %c0_i32_1 = arith.constant 0 : i32
    return %c0_i32, %c0_i32_0 : i32, i32
  }
  func.func @transform_16(%arg0: i32) -> (i32, i32) {
    %c0_i32 = arith.constant 0 : i32
    %c0_i32_0 = arith.constant 0 : i32
    %c0_i32_1 = arith.constant 0 : i32
    return %c0_i32, %c0_i32_0 : i32, i32
  }
  func.func @transform_17(%arg0: i32) -> (i32, i32) {
    %c0_i32 = arith.constant 0 : i32
    %c0_i32_0 = arith.constant 0 : i32
    return %arg0, %c0_i32 : i32, i32
  }
  func.func @transform_18(%arg0: i32) -> (i32, i32, i32) {
    %c0_i32 = arith.constant 0 : i32
    %c0_i32_0 = arith.constant 0 : i32
    %c0_i32_1 = arith.constant 0 : i32
    return %arg0, %c0_i32, %c0_i32_0 : i32, i32, i32
  }
}

</mosaic_0001>

<bundles_post_ra>
// kernel: tile.21
= control target key start
LH: loop header
LB: loop body
LE: loop exit
PB: predicated region body
PF: predicated region fallthrough
CT: control target
= control target key end

     0   :  { %vm4_vm0 = vcmask 916480   ;;  %s169_s0 = inlined_call_operand.vmem [shape: f32[240,5,5], index: 0, kind: input, shape index: {}]   ;;  %s170_s1 = inlined_call_operand.vmem [shape: f32[240,25], index: 1, kind: output, shape index: {}]  }
   0x1   :  { %v57_v0 = vld [vmem:[%s169_s0 + $0x8] sm:$0x1f]   ;;  %v59_v1 = vld [vmem:[%s169_s0 + $0x18] sm:$0x1f]   ;;  %v33_v5 = vld [vmem:[%s169_s0] sm:$0x1f]  }
   0x2   :  { %v62_v2 = vld [vmem:[%s169_s0 + $0x28] sm:$0x1f]   ;;  %58 = vst.msk [vmem:[%s170_s1 + $0x8] sm:$0x1f] %vm4_vm0, %v57_v0   ;;  %60 = vst.msk [vmem:[%s170_s1 + $0xd] sm:$0x7] %vm4_vm0, %v59_v1  }
   0x3   :  { %61 = vst.msk [vmem:[%s170_s1 + $0x15] sm:$0x18] %vm4_vm0, %v59_v1   ;;  %63 = vst.msk [vmem:[%s170_s1 + $0x1a] sm:$0x1f] %vm4_vm0, %v62_v2   ;;  %v64_v3 = vld [vmem:[%s169_s0 + $0x38] sm:$0x1f]  }
   0x4   :  { %v67_v4 = vld [vmem:[%s169_s0 + $0x48] sm:$0x1f]   ;;  %65 = vst.msk [vmem:[%s170_s1 + $0x1f] ss:$9 sm:$0x3] %vm4_vm0, %v64_v3   ;;  %34 = vst [vmem:[%s170_s1] sm:$0x1f] %v33_v5  }
   0x5   :  { %66 = vst.msk [vmem:[%s170_s1 + $0x27] sm:$0x1c] %vm4_vm0, %v64_v3   ;;  %68 = vst.msk [vmem:[%s170_s1 + $0x2c] sm:$0xf] %vm4_vm0, %v67_v4   ;;  %v70_v6 = vld [vmem:[%s169_s0 + $0x10] sm:$0x1f]  }
   0x6   :  { %69 = vst.msk [vmem:[%s170_s1 + $0x34] sm:$0x10] %vm4_vm0, %v67_v4   ;;  %v73_v7 = vld [vmem:[%s169_s0 + $0x20] sm:$0x1f]   ;;  %v75_v8 = vld [vmem:[%s169_s0 + $0x30] sm:$0x1f]  }
   0x7   :  { %71 = vst [vmem:[%s170_s1 + $0x5] sm:$0x7] %v70_v6   ;;  %72 = vst [vmem:[%s170_s1 + $0xd] sm:$0x18] %v70_v6   ;;  %v78_v9 = vld [vmem:[%s169_s0 + $0x40] sm:$0x1f]  }
   0x8   :  { %74 = vst [vmem:[%s170_s1 + $0x12] sm:$0x1f] %v73_v7   ;;  %76 = vst [vmem:[%s170_s1 + $0x17] ss:$9 sm:$0x3] %v75_v8  }
   0x9   :  { %77 = vst [vmem:[%s170_s1 + $0x1f] sm:$0x1c] %v75_v8   ;;  %79 = vst [vmem:[%s170_s1 + $0x24] sm:$0xf] %v78_v9  }
   0xa   :  { %80 = vst [vmem:[%s170_s1 + $0x2c] sm:$0x10] %v78_v9  }

// kernel: tile.30
= control target key start
LH: loop header
LB: loop body
LE: loop exit
PB: predicated region body
PF: predicated region fallthrough
CT: control target
= control target key end

     0   :  { %s22_s0 = inlined_call_operand.vmem [shape: f32[48], index: 0, kind: input, shape index: {}]   ;;  %s23_s1 = inlined_call_operand.vmem [shape: f32[5,48], index: 1, kind: output, shape index: {}]  }
   0x1   :  { %v4_v0 = vld [vmem:[%s22_s0] ss:$0 sm:$0xff] }
   0x2   :  { %5 = vst [vmem:[%s23_s1] sm:$0xff] %v4_v0 }

// kernel: tile.31
= control target key start
LH: loop header
LB: loop body
LE: loop exit
PB: predicated region body
PF: predicated region fallthrough
CT: control target
= control target key end

     0   :  { %vm9_vm0 = vcmask 261120   ;;  %s53_s12 = smov 96   ;;  %s54_s13 = smov 48   ;;  %vm3_vm1 = vcmask 392192   ;;  %vm13_vm2 = vcmask 130048   ;;  %vm16_vm3 = vcmask 1048320   ;;  %s88_s0 = inlined_call_operand.vmem [shape: f32[5,48], index: 0, kind: input, shape index: {}]   ;;  %s89_s1 = inlined_call_operand.vmem [shape: f32[240], index: 1, kind: output, shape index: {}]  }
   0x1   :  { %v44_v0 = vld [vmem:[%s88_s0 + $0x2] sm:$0x1]   ;;  %v47_v3 = vld [vmem:[%s88_s0 + $0x1] sm:$0x1]   ;;  %v46_v4 = vld [vmem:[%s88_s0 + $0x4] sm:$0x1]  }
   0x2   :  { %v45_v1 = vld [vmem:[%s88_s0 + $0x2] sm:$0x1]   ;;  %27 = vrot.lane.b32.xlu1 %v47_v3, %s54_s13  ;;  %v48_v5 = vld [vmem:[%s88_s0 + $0x3] sm:$0x1]   ;;  %v2_v6 = vld [vmem:[%s88_s0] sm:$0x1]  }
   0x3   :  { %v10_v2 = vsel %vm9_vm0, %v45_v1, %v44_v0  ;;  %4 = vst.msk [vmem:[#allocation0] sm:$0x1] %vm3_vm1, %v2_v6   ;;  %s55_s0 = smov 64   ;;  %s56_s20 = smov 16   ;;  %vm29_vm4 = vcmask 785792   ;;  %vm22_vm5 = vcmask 916992  }
   0x4   :  { %11 = vrot.lane.b32.xlu0 %v10_v2, %s53_s12  ;;  %vm35_vm6 = vcmask 523392  }
   0x6   :  { %33 = vrot.lane.b32.xlu1 %v48_v5, %s56_s20 }
   0x8   :  { %20 = vrot.lane.b32.xlu0 %v46_v4, %s55_s0 }
  0x74   :  { %v28_v8 = vpop.permute.xlu1 %27  }
  0x76   :  { %v12_v7 = vpop.permute.xlu0 %11  }
  0x77   :  { %15 = vst.msk [vmem:[#allocation0 + $0x1] sm:$0x1] %vm13_vm2, %v12_v7  }
  0x78   :  { %17 = vst.msk [vmem:[#allocation0] sm:$0x1] %vm16_vm3, %v12_v7   ;;  %v34_v10 = vpop.permute.xlu1 %33  }
  0x79   :  { %30 = vst.msk [vmem:[#allocation0] sm:$0x1] %vm29_vm4, %v28_v8  }
  0x7a   :  { %v21_v9 = vpop.permute.xlu0 %20  }
  0x7b   :  { %24 = vst.msk [vmem:[#allocation0 + $0x1] sm:$0x1] %vm22_vm5, %v21_v9  }
  0x7c   :  { %37 = vst.msk [vmem:[#allocation0 + $0x1] sm:$0x1] %vm35_vm6, %v34_v10  }
  0x83   :  { %v41_v11 = vld [vmem:[#allocation0] sm:$0x3] }
  0x84   :  { %43 = vst [vmem:[%s89_s1] sm:$0x3] %v41_v11 }

// kernel: tile.25
= control target key start
LH: loop header
LB: loop body
LE: loop exit
PB: predicated region body
PF: predicated region fallthrough
CT: control target
= control target key end

     0   :  { %s22_s0 = inlined_call_operand.vmem [shape: f32[16], index: 0, kind: input, shape index: {}]   ;;  %s23_s1 = inlined_call_operand.vmem [shape: f32[5,16], index: 1, kind: output, shape index: {}]  }
   0x1   :  { %v4_v0 = vld [vmem:[%s22_s0] ss:$0 sm:$0xff] }
   0x2   :  { %5 = vst [vmem:[%s23_s1] sm:$0xff] %v4_v0 }

// kernel: tile.26
= control target key start
LH: loop header
LB: loop body
LE: loop exit
PB: predicated region body
PF: predicated region fallthrough
CT: control target
= control target key end

     0   :  { %s43_s10 = smov 64   ;;  %s44_s11 = smov 32   ;;  %vm3_vm0 = vcmask 130048   ;;  %vm9_vm1 = vcmask 654848   ;;  %vm15_vm2 = vcmask 523648   ;;  %vm21_vm3 = vcmask 392448   ;;  %s75_s0 = inlined_call_operand.vmem [shape: f32[5,16], index: 0, kind: input, shape index: {}]   ;;  %s76_s1 = inlined_call_operand.vmem [shape: f32[1,80], index: 1, kind: output, shape index: {}]  }
   0x1   :  { %v35_v0 = vld [vmem:[%s75_s0 + $0x4] sm:$0x1]   ;;  %v37_v1 = vld [vmem:[%s75_s0 + $0x2] sm:$0x1]   ;;  %v36_v2 = vld [vmem:[%s75_s0 + $0x3] sm:$0x1]  }
   0x2   :  { %7 = vrot.lane.b32.xlu0 %v35_v0, %s43_s10  ;;  %19 = vrot.lane.b32.xlu1 %v37_v1, %s44_s11  ;;  %v38_v3 = vld [vmem:[%s75_s0 + $0x1] sm:$0x1]   ;;  %v2_v4 = vld [vmem:[%s75_s0] sm:$0x1]   ;;  %s45_s0 = smov 48   ;;  %s46_s18 = smov 16  }
   0x3   :  { %4 = vst.msk [vmem:[#allocation0] sm:$0x1] %vm3_vm0, %v2_v4   ;;  %vm27_vm4 = vcmask 261248  }
   0x6   :  { %13 = vrot.lane.b32.xlu0 %v36_v2, %s45_s0  ;;  %25 = vrot.lane.b32.xlu1 %v38_v3, %s46_s18 }
  0x74   :  { %v8_v5 = vpop.permute.xlu0 %7   ;;  %v20_v6 = vpop.permute.xlu1 %19  }
  0x75   :  { %10 = vst.msk [vmem:[#allocation0] sm:$0x1] %vm9_vm1, %v8_v5  }
  0x78   :  { %v14_v7 = vpop.permute.xlu0 %13   ;;  %v26_v8 = vpop.permute.xlu1 %25  }
  0x79   :  { %16 = vst.msk [vmem:[#allocation0] sm:$0x1] %vm15_vm2, %v14_v7  }
  0x7a   :  { %22 = vst.msk [vmem:[#allocation0] sm:$0x1] %vm21_vm3, %v20_v6  }
  0x7b   :  { %28 = vst.msk [vmem:[#allocation0] sm:$0x1] %vm27_vm4, %v26_v8  }
  0x82   :  { %v32_v9 = vld [vmem:[#allocation0] sm:$0x1] }
  0x83   :  { %34 = vst [vmem:[%s76_s1] sm:$0x1] %v32_v9 }

// kernel: xconv_forward.3
= control target key start
LH: loop header
LB: loop body
LE: loop exit
PB: predicated region body
PF: predicated region fallthrough
CT: control target
= control target key end

     0   :  { %s392_s15 = smov 0   ;;  %s434_s0 = inlined_call_operand.vmem [shape: f32[256,128], index: 0, kind: input, shape index: {}]   ;;  %s435_s1 = inlined_call_operand.vmem [shape: f32[4,8,128], index: 1, kind: input, shape index: {}]   ;;  %s436_s2 = inlined_call_operand.vmem [shape: f32[1,128], index: 2, kind: input, shape index: {}]   ;;  %s437_s3 = inlined_call_operand.vmem [shape: f32[1,128], index: 3, kind: input, shape index: {}]   ;;  %s438_s4 = inlined_call_operand.vmem [shape: f32[256,128], index: 4, kind: output, shape index: {}]  }
   0x1 LB: > { %s336_s16 = sadd.s32 4294967295, %s365_s15   ;;  %p340_p0 = scmp.ge.s32.totalorder %s365_s15, 1  ;;  %s365_s15 = sphi %s392_s15, %s14_s15  }
   0x2   : > { %p163_p1 = scmp.lt.s32.totalorder %s365_s15, 5 }
   0x4   : > { %p164_p2 = pnand %p340_p0, %p163_p1 }
   0x5   : > { %v201_v0 = vld [vmem:[%s435_s1] sm:$0xff] (!%p164_p2)  ;;  %v202_v1 = vld [vmem:[%s435_s1 + $0x8] sm:$0xff] (!%p164_p2)  ;;  %v203_v2 = vld [vmem:[%s435_s1 + $0x10] sm:$0xff] (!%p164_p2)  ;;  %s341_s25 = sshll.u32 (!%p164_p2), %s336_s16, 3  ;;  %v233_v11 = vlaneseq (!%p164_p2) }
   0x6   : > { %167 = sbr.rel (%p164_p2) target bundleno = 47 (0x2f), region = 36  ;;  %v205_v3 = vadd.f32 (!%p164_p2), %v202_v1, %v201_v0  ;;  %v204_v4 = vld [vmem:[%s435_s1 + $0x18] sm:$0xff] (!%p164_p2)  ;;  %p190_p3 = scmp.lt.s32.totalorder (!%p164_p2), %s341_s25, 31  ;;  %v345_v17 = vld [vmem:[%s436_s2] ss:$0 sm:$0xff] (!%p164_p2) }
   0x7   : > { %v234_v14 = vshrl.u32 (!%p164_p2), %v233_v11, 7  ;;  %v346_v38 = vld [vmem:[%s437_s3] ss:$0 sm:$0xff] (!%p164_p2) }
   0x8   : > { %v206_v5 = vadd.f32 (!%p164_p2), %v205_v3, %v203_v2 }
   0x9   : > { %v235_v15 = vsub.s32 (!%p164_p2), 0, %v234_v14  ;;  %v247_v23 = vsub.s32 (!%p164_p2), 1, %v234_v14 }
   0xa   : > { %v207_v6 = vadd.f32 (!%p164_p2), %v206_v5, %v204_v4 }
   0xc   : > { %v208_v7 = vmul.f32 (!%p164_p2), 0.004166667, %v207_v6 }
   0xd   : > { %s440_s25 = smov (!%p190_p3, %s341_s25), 31 }
   0xe   : > { %v209_v8 = vmul.f32 %v208_v7, %v208_v7  ;;  %s342_s26 = sshll.u32 %s440_s25, 3  ;;  %v236_v16 = vrot.slane %v208_v7, %v235_v15 }
   0xf   : > { %s193_s29 = scalar_lea.vmem %s434_s0, %s342_s26  ;;  %s199_s10 = scalar_lea.vmem %s438_s4, %s342_s26 }
  0x10   : > { %v211_v9 = vrot.slane %v209_v8, 7  ;;  %v225_v18 = vld [vmem:[%s193_s29] sm:$0xff]  ;;  %v226_v19 = vld [vmem:[%s193_s29 + $0x8] sm:$0xff]  ;;  %v227_v20 = vld [vmem:[%s193_s29 + $0x10] sm:$0xff] }
  0x11   : > { %v228_v21 = vld [vmem:[%s193_s29 + $0x18] sm:$0xff]  ;;  %v229_v22 = vld [vmem:[%s193_s29 + $0x20] sm:$0xff]  ;;  %v230_v24 = vld [vmem:[%s193_s29 + $0x28] sm:$0xff]  ;;  %v237_v28 = vsub.f32 %v225_v18, %v236_v16  ;;  %v238_v30 = vsub.f32 %v226_v19, %v236_v16  ;;  %v239_v31 = vsub.f32 %v227_v20, %v236_v16 }
  0x12   : > { %v213_v10 = vsub.f32 %v208_v7, %v211_v9  ;;  %v231_v25 = vld [vmem:[%s193_s29 + $0x30] sm:$0xff]  ;;  %v232_v26 = vld [vmem:[%s193_s29 + $0x38] sm:$0xff]  ;;  %v240_v32 = vsub.f32 %v228_v21, %v236_v16  ;;  %v241_v33 = vsub.f32 %v229_v22, %v236_v16  ;;  %v242_v34 = vsub.f32 %v230_v24, %v236_v16 }
  0x13   : > { %v243_v35 = vsub.f32 %v231_v25, %v236_v16  ;;  %v244_v36 = vsub.f32 %v232_v26, %v236_v16 }
  0x14   : > { %v214_v12 = vmax.f32 %v213_v10, 0.0 }
  0x16   : > { %v215_v13 = vadd.f32 1e-05, %v214_v12 }
  0x18   : > { %357 = vrsqrt.f32 %v215_v13 }
  0x22   : > { %v358_v27 = vpop.eup %357 }
  0x23   : > { %v224_v29 = vmul.f32 %v358_v27, %v345_v17 }
  0x25   : > { %v248_v37 = vrot.slane %v224_v29, %v247_v23 }
  0x27   : > { %v249_v39 = vmul.f32 %v248_v37, %v237_v28  ;;  %v250_v40 = vmul.f32 %v248_v37, %v238_v30  ;;  %v251_v41 = vmul.f32 %v248_v37, %v239_v31  ;;  %v252_v42 = vmul.f32 %v248_v37, %v240_v32 }
  0x28   : > { %v253_v43 = vmul.f32 %v248_v37, %v241_v33  ;;  %v254_v44 = vmul.f32 %v248_v37, %v242_v34  ;;  %v255_v45 = vmul.f32 %v248_v37, %v243_v35  ;;  %v256_v46 = vmul.f32 %v248_v37, %v244_v36 }
  0x29   : > { %v264_v47 = vadd.f32 %v346_v38, %v249_v39  ;;  %v265_v48 = vadd.f32 %v346_v38, %v250_v40  ;;  %v266_v49 = vadd.f32 %v346_v38, %v251_v41  ;;  %v267_v50 = vadd.f32 %v346_v38, %v252_v42 }
  0x2a   : > { %v268_v51 = vadd.f32 %v346_v38, %v253_v43  ;;  %v269_v52 = vadd.f32 %v346_v38, %v254_v44  ;;  %v270_v53 = vadd.f32 %v346_v38, %v255_v45  ;;  %v271_v54 = vadd.f32 %v346_v38, %v256_v46 }
  0x2b   : > { %272 = vst [vmem:[%s199_s10] sm:$0xff] %v264_v47  ;;  %273 = vst [vmem:[%s199_s10 + $0x8] sm:$0xff] %v265_v48 }
  0x2c   : > { %274 = vst [vmem:[%s199_s10 + $0x10] sm:$0xff] %v266_v49  ;;  %275 = vst [vmem:[%s199_s10 + $0x18] sm:$0xff] %v267_v50 }
  0x2d   : > { %276 = vst [vmem:[%s199_s10 + $0x20] sm:$0xff] %v268_v51  ;;  %277 = vst [vmem:[%s199_s10 + $0x28] sm:$0xff] %v269_v52 }
  0x2e   : > { %278 = vst [vmem:[%s199_s10 + $0x30] sm:$0xff] %v270_v53  ;;  %279 = vst [vmem:[%s199_s10 + $0x38] sm:$0xff] %v271_v54 }
  0x2f PF: > { %s14_s15 = sadd.s32 1, %s365_s15  }
  0x30   : > { %p11_p4 = scmp.ge.s32.totalorder %s14_s15, 6  }
  0x32   :  { %13 = sbr.rel (!%p11_p4) target bundleno = 1 (0x1), region = 66 }

// kernel: xconv_forward.2
= control target key start
LH: loop header
LB: loop body
LE: loop exit
PB: predicated region body
PF: predicated region fallthrough
CT: control target
= control target key end

     0   :  { %s2676_s27 = smov 0   ;;  %s3325_s0 = inlined_call_operand.vmem [shape: f32[256,128], index: 0, kind: input, shape index: {}]   ;;  %s3326_s1 = inlined_call_operand.vmem [shape: f32[256,128], index: 1, kind: input, shape index: {}]   ;;  %s3327_s2 = inlined_call_operand.vmem [shape: f32[256,256], index: 2, kind: input, shape index: {}]   ;;  %s3328_s3 = inlined_call_operand.vmem [shape: f32[128,80], index: 3, kind: input, shape index: {}]   ;;  %s3329_s4 = inlined_call_operand.vmem [shape: f32[1,80], index: 4, kind: input, shape index: {}]   ;;  %s3330_s5 = inlined_call_operand.vmem [shape: f32[80,256], index: 5, kind: input, shape index: {}]   ;;  %s3331_s6 = inlined_call_operand.vmem [shape: f32[1,256], index: 6, kind: input, shape index: {}]   ;;  %s3332_s7 = inlined_call_operand.vmem [shape: f32[128,25], index: 7, kind: input, shape index: {}]   ;;  %s3333_s8 = inlined_call_operand.vmem [shape: f32[1,25], index: 8, kind: input, shape index: {}]   ;;  %s3334_s9 = inlined_call_operand.vmem [shape: f32[25,25], index: 9, kind: input, shape index: {}]   ;;  %s3335_s10 = inlined_call_operand.vmem [shape: f32[1,25], index: 10, kind: input, shape index: {}]   ;;  %s3336_s11 = inlined_call_operand.vmem [shape: f32[25,25], index: 11, kind: input, shape index: {}]   ;;  %s3337_s12 = inlined_call_operand.vmem [shape: f32[1,25], index: 12, kind: input, shape index: {}]   ;;  %s3338_s13 = inlined_call_operand.vmem [shape: f32[1,25,256], index: 13, kind: input, shape index: {}]   ;;  %s3339_s14 = inlined_call_operand.vmem [shape: f32[1,256,128], index: 14, kind: input, shape index: {}]   ;;  %s3340_s15 = inlined_call_operand.vmem [shape: f32[1,48], index: 15, kind: input, shape index: {}]   ;;  %s3341_s16 = inlined_call_operand.vmem [shape: f32[48,128], index: 16, kind: input, shape index: {}]   ;;  %s3342_s17 = inlined_call_operand.vmem [shape: f32[256,128], index: 17, kind: output, shape index: {0}]   ;;  %s3343_s18 = inlined_call_operand.vmem [shape: f32[4,8,128], index: 18, kind: output, shape index: {1}]  }
   0x1   :  { %3345 = sst [smem:[#allocation3_spill]] %s3325_s0 }
   0x2   :  { %3346 = sst [smem:[#allocation4_spill]] %s3326_s1 }
   0x3   :  { %3347 = sst [smem:[#allocation5_spill]] %s3327_s2 }
   0x4   :  { %3348 = sst [smem:[#allocation6_spill]] %s3343_s18 }
   0x5 LB: > { %3349 = sst [smem:[#allocation2_spill]] %s2575_s27  ;;  %s2682_s28 = sadd.s32 4294967295, %s2575_s27   ;;  %s2575_s27 = sphi %s2676_s27, %s29_s27  }
   0x6   : > { %p2064_p0 = scmp.ge.s32.totalorder %s2575_s27, 1  ;;  %p539_p1 = scmp.lt.s32.totalorder %s2575_s27, 5 }
   0x8   : > { %p540_p2 = pnand %p2064_p0, %p539_p1 }
   0x9   : > { %v661_v0 = vld [vmem:[%s3328_s3] sm:$0xff] (!%p540_p2)  ;;  %v662_v1 = vld [vmem:[%s3328_s3 + $0x8] sm:$0xff] (!%p540_p2)  ;;  %v663_v2 = vld [vmem:[%s3328_s3 + $0x10] sm:$0xff] (!%p540_p2)  ;;  %s2065_s21 = sshll.u32 (!%p540_p2), %s2682_s28, 3  ;;  %s3350_s26 = sld [smem:[#allocation3_spill]] (!%p540_p2)  ;;  %vm829_vm0 = vcmask (!%p540_p2), 654336  }
   0xa   : > { %543 = sbr.rel (%p540_p2) target bundleno = 1427 (0x593), region = 88  ;;  %v2398_v3 = vpack.c.bf16 (!%p540_p2), %v662_v1, %v661_v0  ;;  %v664_v4 = vld [vmem:[%s3328_s3 + $0x18] sm:$0xff] (!%p540_p2)  ;;  %p609_p3 = scmp.lt.s32.totalorder (!%p540_p2), %s2065_s21, 31  ;;  %v665_v6 = vld [vmem:[%s3328_s3 + $0x20] sm:$0xff] (!%p540_p2)  ;;  %v666_v7 = vld [vmem:[%s3328_s3 + $0x28] sm:$0xff] (!%p540_p2)  ;;  %vm1187_vm1 = vcmask (!%p540_p2), 1040384  }
   0xb   : > { %v2402_v5 = vpack.c.bf16 (!%p540_p2), %v664_v4, %v663_v2  ;;  %v2406_v8 = vpack.c.bf16 (!%p540_p2), %v666_v7, %v665_v6  ;;  %v667_v9 = vld [vmem:[%s3328_s3 + $0x30] sm:$0xff] (!%p540_p2)  ;;  %v798_v10 = vld [vmem:[%s3330_s5 + $0x8] sm:$0xff] (!%p540_p2)  ;;  %v800_v11 = vld [vmem:[%s3330_s5 + $0x18] sm:$0xff] (!%p540_p2)  ;;  %s3351_s18 = sld [smem:[#allocation4_spill]] (!%p540_p2)  ;;  %vm2578_vm2 = vmmov (!%p540_p2), 1   ;;  %s3354_s27 = sld [smem:[#allocation5_spill]] (!%p540_p2) }
   0xc   : > { %2399 = vmatprep.subr.bf16.mxu0 (!%p540_p2), %v2398_v3  ;;  %v668_v12 = vld [vmem:[%s3328_s3 + $0x38] sm:$0xff] (!%p540_p2)  ;;  %v2430_v13 = vpack.c.bf16 (!%p540_p2), %v800_v11, %v798_v10  ;;  %v797_v14 = vld [vmem:[%s3330_s5] sm:$0xff] (!%p540_p2)  ;;  %v799_v15 = vld [vmem:[%s3330_s5 + $0x10] sm:$0xff] (!%p540_p2)  ;;  %vm1162_vm4 = vcmask (!%p540_p2), 203776   ;;  %vm2580_vm5 = vmmov (!%p540_p2), 0   ;;  %vm1454_vm6 = vcmask (!%p540_p2), 392192  }
   0xd   : > { %2401 = vmatpush3.bf16.msra.mxu0 (!%p540_p2), %v2398_v3  ;;  %v2432_v18 = vpack.c.bf16 (!%p540_p2), %v799_v15, %v797_v14  ;;  %v2410_v20 = vpack.c.bf16 (!%p540_p2), %v668_v12, %v667_v9  ;;  %v669_v21 = vld [vmem:[%s3328_s3 + $0x40] sm:$0xff] (!%p540_p2)  ;;  %v670_v22 = vld [vmem:[%s3328_s3 + $0x48] sm:$0xff] (!%p540_p2)  ;;  %v671_v24 = vld [vmem:[%s3328_s3 + $0x50] sm:$0xff] (!%p540_p2)  ;;  %s2116_s20 = sshll.u32 (!%p540_p2), %s2682_s28, 6  ;;  %p633_p4 = scmp.lt.s32.totalorder (!%p540_p2), %s2682_s28, 3  ;;  %vm1946_vm15 = vcmask (!%p540_p2), 1041408  }
   0xe   : > { %2403 = vmatprep.subr.bf16.mxu0 (!%p540_p2), %v2402_v5  ;;  %2431 = vmatprep.subr.bf16.mxu1 (!%p540_p2), %v2430_v13  ;;  %v802_v23 = vld [vmem:[%s3330_s5 + $0x28] sm:$0xff] (!%p540_p2)  ;;  %v672_v25 = vld [vmem:[%s3328_s3 + $0x58] sm:$0xff] (!%p540_p2)  ;;  %v801_v27 = vld [vmem:[%s3330_s5 + $0x20] sm:$0xff] (!%p540_p2)  ;;  %v2414_v28 = vpack.c.bf16 (!%p540_p2), %v670_v22, %v669_v21 }
   0xf   : > { %2433 = vmatpush1.bf16.msra.mxu1 (!%p540_p2), %v2432_v18  ;;  %v804_v26 = vld [vmem:[%s3330_s5 + $0x38] sm:$0xff] (!%p540_p2)  ;;  %v803_v30 = vld [vmem:[%s3330_s5 + $0x30] sm:$0xff] (!%p540_p2)  ;;  %v806_v31 = vld [vmem:[%s3330_s5 + $0x48] sm:$0xff] (!%p540_p2)  ;;  %v2418_v40 = vpack.c.bf16 (!%p540_p2), %v672_v25, %v671_v24 }
  0x10   : > { %v2434_v29 = vpack.c.bf16 (!%p540_p2), %v804_v26, %v802_v23  ;;  %v808_v32 = vld [vmem:[%s3330_s5 + $0x58] sm:$0xff] (!%p540_p2)  ;;  %v2436_v33 = vpack.c.bf16 (!%p540_p2), %v803_v30, %v801_v27  ;;  %v805_v35 = vld [vmem:[%s3330_s5 + $0x40] sm:$0xff] (!%p540_p2)  ;;  %v807_v36 = vld [vmem:[%s3330_s5 + $0x50] sm:$0xff] (!%p540_p2) }
  0x11   : > { %s3358_s21 = smov (!%p609_p3, %s2065_s21), 31  ;;  %2405 = vmatpush3.bf16.msra.mxu0 %v2402_v5  ;;  %v2438_v34 = vpack.c.bf16 %v808_v32, %v806_v31  ;;  %v810_v37 = vld [vmem:[%s3330_s5 + $0x68] sm:$0xff]  ;;  %v812_v38 = vld [vmem:[%s3330_s5 + $0x78] sm:$0xff]  ;;  %v2440_v39 = vpack.c.bf16 %v807_v36, %v805_v35  ;;  %v809_v42 = vld [vmem:[%s3330_s5 + $0x60] sm:$0xff]  ;;  %s3360_s28 = smov (!%p633_p4, %s2682_s28), 3 }
  0x12   : > { %s2711_s0 = sshll.u32 %s3358_s21, 3  ;;  %2407 = vmatprep.subr.bf16.mxu0 %v2406_v8  ;;  %2435 = vmatprep.subr.bf16.mxu1 %v2434_v29  ;;  %v2442_v41 = vpack.c.bf16 %v812_v38, %v810_v37  ;;  %v811_v43 = vld [vmem:[%s3330_s5 + $0x70] sm:$0xff]  ;;  %v673_v44 = vld [vmem:[%s3328_s3 + $0x60] sm:$0xff]  ;;  %v674_v45 = vld [vmem:[%s3328_s3 + $0x68] sm:$0xff] }
  0x13   : > { %s2726_s29 = scalar_lea.vmem %s3350_s26, %s2711_s0  ;;  %s2732_s19 = scalar_lea.vmem %s3351_s18, %s2711_s0  ;;  %2437 = vmatpush1.bf16.msra.mxu1 %v2436_v33  ;;  %v2444_v46 = vpack.c.bf16 %v811_v43, %v809_v42  ;;  %v2422_v47 = vpack.c.bf16 %v674_v45, %v673_v44  ;;  %v675_v48 = vld [vmem:[%s3328_s3 + $0x70] sm:$0xff]  ;;  %v676_v49 = vld [vmem:[%s3328_s3 + $0x78] sm:$0xff]  ;;  %v813_v11 = vld [vmem:[%s3330_s5 + $0x80] sm:$0xff] }
  0x14   : > { %v637_v16 = vld [vmem:[%s2726_s29] sm:$0xff]  ;;  %2439 = vmatprep.subr.bf16.mxu1 %v2438_v34  ;;  %v2426_v50 = vpack.c.bf16 %v676_v49, %v675_v48  ;;  %v638_v51 = vld [vmem:[%s2726_s29 + $0x8] sm:$0xff]  ;;  %v639_v53 = vld [vmem:[%s2726_s29 + $0x10] sm:$0xff]  ;;  %s2119_s18 = sshll.u32 %s3358_s21, 4 }
  0x15   : > { %v645_v17 = vld [vmem:[%s2732_s19] sm:$0xff]  ;;  %2409 = vmatpush3.bf16.msra.mxu0 %v2406_v8  ;;  %v646_v52 = vld [vmem:[%s2732_s19 + $0x8] sm:$0xff]  ;;  %v647_v54 = vld [vmem:[%s2732_s19 + $0x10] sm:$0xff]  ;;  %s2988_s23 = scalar_lea.vmem %s3354_s27, %s2119_s18  ;;  %s3287_s18 = scalar_lea.vmem %s3342_s17, %s2711_s0 }
  0x16   : > { %v2742_v19 = vsub.f32 %v637_v16, %v645_v17  ;;  %2411 = vmatprep.subr.bf16.mxu0 %v2410_v20  ;;  %v2809_v55 = vsub.f32 %v638_v51, %v646_v52  ;;  %v2811_v56 = vsub.f32 %v639_v53, %v647_v54  ;;  %v640_v57 = vld [vmem:[%s2726_s29 + $0x18] sm:$0xff]  ;;  %v641_v59 = vld [vmem:[%s2726_s29 + $0x20] sm:$0xff]  ;;  %v642_v63 = vld [vmem:[%s2726_s29 + $0x28] sm:$0xff]  ;;  %v2577_v17 = vmov 0.0   ;;  %s2074_s0 = sshll.u32 %s3360_s28, 3  ;;  %s3355_s27 = sld [smem:[#allocation6_spill]] }
  0x17   : > { %2441 = vmatpush1.bf16.msra.mxu1 %v2440_v39  ;;  %v648_v58 = vld [vmem:[%s2732_s19 + $0x18] sm:$0xff]  ;;  %v649_v60 = vld [vmem:[%s2732_s19 + $0x20] sm:$0xff]  ;;  %v650_v0 = vld [vmem:[%s2732_s19 + $0x28] sm:$0xff]  ;;  %918 = vmatprep.mubr.f32.mxu1 %v2577_v17 }
  0x18   : > { %2287 = vmatprep.mubr.f32.mxu0 %v2742_v19  ;;  %2443 = vmatprep.subr.bf16.mxu1 %v2442_v41  ;;  %v2818_v61 = vsub.f32 %v640_v57, %v648_v58  ;;  %v2821_v62 = vsub.f32 %v641_v59, %v649_v60  ;;  %v643_v1 = vld [vmem:[%s2726_s29 + $0x30] sm:$0xff]  ;;  %v2828_v3 = vsub.f32 %v642_v63, %v650_v0  ;;  %v644_v5 = vld [vmem:[%s2726_s29 + $0x38] sm:$0xff]  ;;  %v814_v8 = vld [vmem:[%s3330_s5 + $0x88] sm:$0xff] }
  0x19   : > { %2413 = vmatpush3.bf16.msra.mxu0 %v2410_v20  ;;  %v651_v2 = vld [vmem:[%s2732_s19 + $0x30] sm:$0xff]  ;;  %v652_v6 = vld [vmem:[%s2732_s19 + $0x38] sm:$0xff]  ;;  %v1015_v14 = vld [vmem:[%s3332_s7] sm:$0xff] }
  0x1a   : > { %2415 = vmatprep.subr.bf16.mxu0 %v2414_v28  ;;  %v2831_v4 = vsub.f32 %v643_v1, %v651_v2  ;;  %v2836_v7 = vsub.f32 %v644_v5, %v652_v6  ;;  %v816_v9 = vld [vmem:[%s3330_s5 + $0x98] sm:$0xff]  ;;  %v815_v12 = vld [vmem:[%s3330_s5 + $0x90] sm:$0xff]  ;;  %v1016_v15 = vld [vmem:[%s3332_s7 + $0x8] sm:$0xff] }
  0x1b   : > { %2445 = vmatpush1.bf16.msra.mxu1 %v2444_v46  ;;  %v2446_v10 = vpack.c.bf16 %v816_v9, %v814_v8  ;;  %v2448_v13 = vpack.c.bf16 %v815_v12, %v813_v11  ;;  %v2450_v16 = vpack.c.bf16 %v1016_v15, %v1015_v14  ;;  %v2862_v18 = vld [vmem:[%s3329_s4] ss:$0 sm:$0xff]  ;;  %v1017_v22 = vld [vmem:[%s3332_s7 + $0x10] sm:$0xff]  ;;  %v1018_v23 = vld [vmem:[%s3332_s7 + $0x18] sm:$0xff] }
  0x1c   : > { %v1019_v30 = vld [vmem:[%s3332_s7 + $0x20] sm:$0xff]  ;;  %v1020_v31 = vld [vmem:[%s3332_s7 + $0x28] sm:$0xff]  ;;  %v1021_v37 = vld [vmem:[%s3332_s7 + $0x30] sm:$0xff] }
  0x1d   : > { %2417 = vmatpush3.bf16.msra.mxu0 %v2414_v28  ;;  %2447 = vmatprep.subr.bf16.mxu1 %v2446_v10  ;;  %v2454_v28 = vpack.c.bf16 %v1018_v23, %v1017_v22  ;;  %v2458_v34 = vpack.c.bf16 %v1020_v31, %v1019_v30  ;;  %v1022_v38 = vld [vmem:[%s3332_s7 + $0x38] sm:$0xff]  ;;  %v1023_v43 = vld [vmem:[%s3332_s7 + $0x40] sm:$0xff]  ;;  %v1024_v44 = vld [vmem:[%s3332_s7 + $0x48] sm:$0xff]  ;;  %v819_v10 = vlaneseq }
  0x1e   : > { %2419 = vmatprep.subr.bf16.mxu0 %v2418_v40  ;;  %v2462_v41 = vpack.c.bf16 %v1022_v38, %v1021_v37  ;;  %v2466_v48 = vpack.c.bf16 %v1024_v44, %v1023_v43  ;;  %v1025_v49 = vld [vmem:[%s3332_s7 + $0x50] sm:$0xff]  ;;  %v1027_v54 = vld [vmem:[%s3332_s7 + $0x60] sm:$0xff]  ;;  %v1028_v57 = vld [vmem:[%s3332_s7 + $0x68] sm:$0xff] }
  0x1f   : > { %2449 = vmatpush1.bf16.msra.mxu1 %v2448_v13  ;;  %v2474_v60 = vpack.c.bf16 %v1028_v57, %v1027_v54  ;;  %v1029_v63 = vld [vmem:[%s3332_s7 + $0x70] sm:$0xff]  ;;  %v1030_v0 = vld [vmem:[%s3332_s7 + $0x78] sm:$0xff]  ;;  %v1151_v8 = vld [vmem:[%s3334_s9] sm:$0xff]  ;;  %v2971_v11 = vshrl.u32 %v819_v10, 7 }
  0x20   : > { %2451 = vmatprep.subr.bf16.mxu1 %v2450_v16  ;;  %v2478_v5 = vpack.c.bf16 %v1030_v0, %v1029_v63  ;;  %vm2950_vm3 = vmpackc.low %vm1187_vm1, %vm2578_vm2  ;;  %v817_v13 = vld [vmem:[%s3331_s6] sm:$0x3]  ;;  %v990_v57 = vld [vmem:[%s2988_s23 + $0x38] sm:$0xff] }
  0x21   : > { %2421 = vmatpush3.bf16.msra.mxu0 %v2418_v40  ;;  %v821_v12 = vsub.s32 0, %v2971_v11  ;;  %v825_v14 = vsub.s32 1, %v2971_v11  ;;  %v983_v23 = vld [vmem:[%s2988_s23] sm:$0xff]  ;;  %v993_v10 = vld [vmem:[%s2988_s23 + $0x50] sm:$0xff] }
  0x22   : > { %2423 = vmatprep.subr.bf16.mxu0 %v2422_v47  ;;  %v987_v43 = vld [vmem:[%s2988_s23 + $0x20] sm:$0xff] }
  0x23   : > { %v2981_v15 = vrot.slane %v817_v13, %v821_v12 }
  0x25   : > { %2425 = vmatpush3.bf16.msra.mxu0 %v2422_v47 }
  0x26   : > { %2427 = vmatprep.subr.bf16.mxu0 %v2426_v50 }
  0x29   : > { %2429 = vmatpush3.bf16.msra.mxu0 %v2426_v50  ;;  %v1026_v50 = vld [vmem:[%s3332_s7 + $0x58] sm:$0xff] }
  0x2a   : > { %v2470_v53 = vpack.c.bf16 %v1026_v50, %v1025_v49 }
  0x2c   : > { %2288 = vmatmul.mubr.f32.vlgmr.msra.gmra.mrb[0].mxu0 %v2809_v55 }
  0x2d   : > { %2290 = vmatprep.mubr.f32.mxu0 %v2811_v56 }
  0x30   : > { %2291 = vmatmul.mubr.f32.gmra.mrb[2].mxu0 %v2818_v61 }
  0x31   : > { %2293 = vmatprep.mubr.f32.mxu0 %v2821_v62 }
  0x34   : > { %2294 = vmatmul.mubr.f32.gmra.mrb[4].mxu0 %v2828_v3 }
  0x35   : > { %2296 = vmatprep.mubr.f32.mxu0 %v2831_v4 }
  0x38   : > { %2297 = vmatmul.mubr.f32.gmra.mrb[6].mxu0 %v2836_v7 }
  0xff   : > { %v2289_v20 = vpop.f32.mrb[0].mxu0 }
 0x100   : > { %v750_v21 = vpop.f32.mrb[1].mxu0  ;;  %v756_v25 = vadd.f32 %v2289_v20, %v2862_v18 }
 0x101   : > { %v751_v24 = vadd.f32 %v2862_v18, %v750_v21 }
 0x102   : > { %v790_v33 = vmax.f32 %v756_v25, 0.0  ;;  %v984_v25 = vld [vmem:[%s2988_s23 + $0x8] sm:$0xff] }
 0x103   : > { %v789_v26 = vmax.f32 %v751_v24, 0.0  ;;  %v2292_v27 = vpop.f32.mrb[2].mxu0 }
 0x104   : > { %v760_v29 = vpop.f32.mrb[3].mxu0  ;;  %v766_v40 = vadd.f32 %v2292_v27, %v2862_v18 }
 0x105   : > { %2076 = vmatmul.mubr.msk.f32.vlgmr.msra.gmra.mrb[0].mxu1 %vm829_vm0, %v789_v26  ;;  %v761_v32 = vadd.f32 %v2862_v18, %v760_v29 }
 0x106   : > { %2453 = vmatpush3.bf16.msra.mxu1 %v2450_v16  ;;  %924 = vmatprep.mubr.f32.mxu1 %v2577_v17  ;;  %v792_v47 = vmax.f32 %v766_v40, 0.0  ;;  %v2983_v16 = vrot.slane %v817_v13, %v825_v14  ;;  %v994_v14 = vld [vmem:[%s2988_s23 + $0x58] sm:$0xff] }
 0x107   : > { %2455 = vmatprep.subr.bf16.mxu1 %v2454_v28  ;;  %v2295_v35 = vpop.f32.mrb[4].mxu0  ;;  %v791_v39 = vmax.f32 %v761_v32, 0.0 }
 0x108   : > { %v770_v36 = vpop.f32.mrb[5].mxu0  ;;  %v776_v52 = vadd.f32 %v2295_v35, %v2862_v18  ;;  %v986_v35 = vld [vmem:[%s2988_s23 + $0x18] sm:$0xff] }
 0x109   : > { %2077 = vmatmul.mubr.msk.f32.gmra.mrb[2].mxu1 %vm829_vm0, %v790_v33  ;;  %v771_v46 = vadd.f32 %v2862_v18, %v770_v36  ;;  %v985_v33 = vld [vmem:[%s2988_s23 + $0x10] sm:$0xff] }
 0x10a   : > { %2457 = vmatpush3.bf16.msra.mxu1 %v2454_v28  ;;  %930 = vmatprep.mubr.f32.mxu1 %v2577_v17  ;;  %v794_v59 = vmax.f32 %v776_v52, 0.0 }
 0x10b   : > { %2459 = vmatprep.subr.bf16.mxu1 %v2458_v34  ;;  %v2298_v42 = vpop.f32.mrb[6].mxu0  ;;  %v793_v51 = vmax.f32 %v771_v46, 0.0 }
 0x10c   : > { %v780_v45 = vpop.f32.mrb[7].mxu0  ;;  %v786_v2 = vadd.f32 %v2298_v42, %v2862_v18 }
 0x10d   : > { %2078 = vmatmul.mubr.msk.f32.gmra.mrb[4].mxu1 %vm829_vm0, %v791_v39  ;;  %v781_v58 = vadd.f32 %v2862_v18, %v780_v45  ;;  %v988_v45 = vld [vmem:[%s2988_s23 + $0x28] sm:$0xff] }
 0x10e   : > { %2461 = vmatpush3.bf16.msra.mxu1 %v2458_v34  ;;  %936 = vmatprep.mubr.f32.mxu1 %v2577_v17  ;;  %v796_v6 = vmax.f32 %v786_v2, 0.0 }
 0x10f   : > { %2463 = vmatprep.subr.bf16.mxu1 %v2462_v41  ;;  %v795_v1 = vmax.f32 %v781_v58, 0.0 }
 0x111   : > { %2079 = vmatmul.mubr.msk.f32.gmra.mrb[6].mxu1 %vm829_vm0, %v792_v47 }
 0x112   : > { %2465 = vmatpush3.bf16.msra.mxu1 %v2462_v41  ;;  %942 = vmatprep.mubr.f32.mxu1 %v2577_v17 }
 0x113   : > { %2467 = vmatprep.subr.bf16.mxu1 %v2466_v48 }
 0x115   : > { %2080 = vmatmul.mubr.msk.f32.gmra.mrb[8].mxu1 %vm829_vm0, %v793_v51 }
 0x116   : > { %2469 = vmatpush3.bf16.msra.mxu1 %v2466_v48  ;;  %948 = vmatprep.mubr.f32.mxu1 %v2577_v17 }
 0x117   : > { %2471 = vmatprep.subr.bf16.mxu1 %v2470_v53 }
 0x119   : > { %2081 = vmatmul.mubr.msk.f32.gmra.mrb[10].mxu1 %vm829_vm0, %v794_v59 }
 0x11a   : > { %2473 = vmatpush3.bf16.msra.mxu1 %v2470_v53  ;;  %954 = vmatprep.mubr.f32.mxu1 %v2577_v17  ;;  %v989_v53 = vld [vmem:[%s2988_s23 + $0x30] sm:$0xff] }
 0x11b   : > { %2475 = vmatprep.subr.bf16.mxu1 %v2474_v60 }
 0x11d   : > { %2082 = vmatmul.mubr.msk.f32.gmra.mrb[12].mxu1 %vm829_vm0, %v795_v1 }
 0x11e   : > { %2477 = vmatpush3.bf16.msra.mxu1 %v2474_v60  ;;  %960 = vmatprep.mubr.f32.mxu1 %v2577_v17 }
 0x11f   : > { %2479 = vmatprep.subr.bf16.mxu1 %v2478_v5 }
 0x121   : > { %2083 = vmatmul.mubr.msk.f32.gmra.mrb[14].mxu1 %vm829_vm0, %v796_v6 }
 0x122   : > { %2481 = vmatpush3.bf16.msra.mxu1 %v2478_v5  ;;  %2331 = vmatprep.mubr.f32.mxu1 %v2742_v19  ;;  %v1152_v19 = vld [vmem:[%s3334_s9 + $0x8] sm:$0xff]  ;;  %v991_v5 = vld [vmem:[%s2988_s23 + $0x40] sm:$0xff] }
 0x125   : > { %2332 = vmatmul.mubr.f32.vlgmr.msra.gmra.mrb[16].mxu1 %v2809_v55  ;;  %v2482_v55 = vpack.c.bf16 %v1152_v19, %v1151_v8  ;;  %v992_v8 = vld [vmem:[%s2988_s23 + $0x48] sm:$0xff] }
 0x126   : > { %2334 = vmatprep.mubr.f32.mxu1 %v2811_v56  ;;  %v1153_v56 = vld [vmem:[%s3334_s9 + $0x10] sm:$0xff] }
 0x127   : > { %2483 = vmatprep.subr.bf16.mxu0 %v2482_v55  ;;  %2553 = vmatprep.subr.bf16.mxu1 %v2482_v55 }
 0x128   : > { %2485 = vmatpush3.bf16.msra.mxu0 %v2482_v55  ;;  %2555 = vmatpush3.bf16.msra.mxu1 %v2482_v55 }
 0x129   : > { %2335 = vmatmul.mubr.f32.gmra.mrb[18].mxu1 %v2818_v61  ;;  %v1154_v61 = vld [vmem:[%s3334_s9 + $0x18] sm:$0x1] }
 0x12a   : > { %2337 = vmatprep.mubr.f32.mxu1 %v2821_v62  ;;  %v2486_v62 = vpack.c.bf16 %v1154_v61, %v1153_v56 }
 0x12c   : > { %2488 = vmatprep.subr.msk.bf16.mxu0 %vm2950_vm3, %v2486_v62  ;;  %2554 = vmatprep.subr.msk.bf16.mxu1 %vm2950_vm3, %v2486_v62 }
 0x12d   : > { %2338 = vmatmul.mubr.f32.gmra.mrb[20].mxu1 %v2828_v3  ;;  %2491 = vmatpush3.bf16.msk.msra.mxu0 %vm2950_vm3, %v2486_v62  ;;  %v1696_v3 = vld [vmem:[%s3339_s14 + $0x8] sm:$0xff] }
 0x12e   : > { %2340 = vmatprep.mubr.f32.mxu1 %v2831_v4  ;;  %2556 = vmatpush3.bf16.msk.msra.mxu1 %vm2950_vm3, %v2486_v62  ;;  %v1304_v4 = vld [vmem:[%s3336_s11] sm:$0xff] }
 0x131   : > { %2341 = vmatmul.mubr.f32.gmra.mrb[22].mxu1 %v2836_v7  ;;  %v1305_v7 = vld [vmem:[%s3336_s11 + $0x8] sm:$0xff] }
 0x132   : > { %v2968_v9 = vpack.c.bf16 %v1305_v7, %v1304_v4 }
 0x134   : > { %2493 = vmatprep.subr.bf16.mxu0 %v2968_v9 }
 0x1d8   : > { %v920_v18 = vpop.f32.mrb[0].mxu1 }
 0x1d9   : > { %v921_v20 = vadd.f32 %v920_v18, %v2981_v15  ;;  %v922_v21 = vpop.f32.mrb[1].mxu1 }
 0x1da   : > { %v923_v22 = vadd.f32 %v922_v21, %v2983_v16 }
 0x1db   : > { %v967_v24 = vmax.f32 %v921_v20, 0.0 }
 0x1dc   : > { %v968_v26 = vmax.f32 %v923_v22, 0.0  ;;  %v926_v27 = vpop.f32.mrb[2].mxu1 }
 0x1dd   : > { %v927_v28 = vadd.f32 %v926_v27, %v2981_v15  ;;  %v928_v29 = vpop.f32.mrb[3].mxu1  ;;  %v2995_v30 = vadd.f32 %v983_v23, %v967_v24 }
 0x1de   : > { %v929_v31 = vadd.f32 %v928_v29, %v2983_v16  ;;  %v2998_v32 = vadd.f32 %v984_v25, %v968_v26  ;;  %v995_v26 = vld [vmem:[%s2988_s23 + $0x60] sm:$0xff] }
 0x1df   : > { %v969_v34 = vmax.f32 %v927_v28, 0.0  ;;  %v996_v28 = vld [vmem:[%s2988_s23 + $0x68] sm:$0xff] }
 0x1e0   : > { %v970_v36 = vmax.f32 %v929_v31, 0.0  ;;  %v932_v37 = vpop.f32.mrb[4].mxu1 }
 0x1e1   : > { %v933_v38 = vadd.f32 %v932_v37, %v2981_v15  ;;  %v934_v39 = vpop.f32.mrb[5].mxu1  ;;  %v3003_v40 = vadd.f32 %v985_v33, %v969_v34  ;;  %v2084_v37 = vld [vmem:[%s3333_s8] ss:$0 sm:$0xff] }
 0x1e2   : > { %v935_v41 = vadd.f32 %v934_v39, %v2983_v16  ;;  %v3006_v42 = vadd.f32 %v986_v35, %v970_v36  ;;  %v997_v39 = vld [vmem:[%s2988_s23 + $0x70] sm:$0xff] }
 0x1e3   : > { %v971_v44 = vmax.f32 %v933_v38, 0.0 }
 0x1e4   : > { %v972_v46 = vmax.f32 %v935_v41, 0.0  ;;  %v938_v47 = vpop.f32.mrb[6].mxu1 }
 0x1e5   : > { %v939_v48 = vadd.f32 %v938_v47, %v2981_v15  ;;  %v940_v49 = vpop.f32.mrb[7].mxu1  ;;  %v3011_v50 = vadd.f32 %v987_v43, %v971_v44  ;;  %v998_v43 = vld [vmem:[%s2988_s23 + $0x78] sm:$0xff]  ;;  %s636_s23 = scalar_lea.vmem %s3355_s27, %s2074_s0 }
 0x1e6   : > { %v941_v51 = vadd.f32 %v940_v49, %v2983_v16  ;;  %v3014_v52 = vadd.f32 %v988_v45, %v972_v46 }
 0x1e7   : > { %v973_v54 = vmax.f32 %v939_v48, 0.0 }
 0x1e8   : > { %v974_v58 = vmax.f32 %v941_v51, 0.0  ;;  %v944_v59 = vpop.f32.mrb[8].mxu1 }
 0x1e9   : > { %v945_v60 = vadd.f32 %v944_v59, %v2981_v15  ;;  %v946_v63 = vpop.f32.mrb[9].mxu1  ;;  %v3019_v0 = vadd.f32 %v989_v53, %v973_v54 }
 0x1ea   : > { %v947_v1 = vadd.f32 %v946_v63, %v2983_v16  ;;  %v3022_v2 = vadd.f32 %v990_v57, %v974_v58 }
 0x1eb   : > { %v975_v6 = vmax.f32 %v945_v60, 0.0 }
 0x1ec   : > { %v976_v19 = vmax.f32 %v947_v1, 0.0  ;;  %v950_v55 = vpop.f32.mrb[10].mxu1 }
 0x1ed   : > { %v951_v56 = vadd.f32 %v950_v55, %v2981_v15  ;;  %v952_v61 = vpop.f32.mrb[11].mxu1  ;;  %v3027_v62 = vadd.f32 %v991_v5, %v975_v6 }
 0x1ee   : > { %v953_v4 = vadd.f32 %v952_v61, %v2983_v16  ;;  %v3030_v7 = vadd.f32 %v992_v8, %v976_v19 }
 0x1ef   : > { %v977_v13 = vmax.f32 %v951_v56, 0.0 }
 0x1f0   : > { %v978_v18 = vmax.f32 %v953_v4, 0.0  ;;  %v956_v20 = vpop.f32.mrb[12].mxu1 }
 0x1f1   : > { %v957_v21 = vadd.f32 %v956_v20, %v2981_v15  ;;  %v958_v22 = vpop.f32.mrb[13].mxu1  ;;  %v3035_v23 = vadd.f32 %v993_v10, %v977_v13  ;;  %v1448_v20 = vld [vmem:[%s3341_s16] sm:$0xff] }
 0x1f2   : > { %v959_v24 = vadd.f32 %v958_v22, %v2983_v16  ;;  %v3038_v25 = vadd.f32 %v994_v14, %v978_v18  ;;  %v1307_v14 = vld [vmem:[%s3336_s11 + $0x18] sm:$0x1]  ;;  %v1450_v22 = vld [vmem:[%s3341_s16 + $0x10] sm:$0xff] }
 0x1f3   : > { %v979_v27 = vmax.f32 %v957_v21, 0.0  ;;  %v1449_v21 = vld [vmem:[%s3341_s16 + $0x8] sm:$0xff] }
 0x1f4   : > { %v980_v29 = vmax.f32 %v959_v24, 0.0  ;;  %v962_v31 = vpop.f32.mrb[14].mxu1  ;;  %v2579_v24 = vmov 0.0|0.0  }
 0x1f5   : > { %v963_v33 = vadd.f32 %v962_v31, %v2981_v15  ;;  %v964_v34 = vpop.f32.mrb[15].mxu1  ;;  %v3043_v35 = vadd.f32 %v995_v26, %v979_v27  ;;  %2502 = vmatprep.subr.bf16.mxu1 %v2579_v24  ;;  %v2503_v26 = vpack.c.bf16 %v1449_v21, %v1448_v20  ;;  %v1451_v27 = vld [vmem:[%s3341_s16 + $0x18] sm:$0xff]  ;;  %v1453_v31 = vld [vmem:[%s3341_s16 + $0x28] sm:$0xff]  ;;  %v1532_v21 = vld [vmem:[%s3338_s13 + $0x20] sm:$0xff] }
 0x1f6   : > { %v965_v36 = vadd.f32 %v964_v34, %v2983_v16  ;;  %v3049_v38 = vadd.f32 %v996_v28, %v980_v29  ;;  %v2506_v28 = vpack.c.bf16 %v1451_v27, %v1450_v22  ;;  %v1452_v29 = vld [vmem:[%s3341_s16 + $0x20] sm:$0xff]  ;;  %v1531_v34 = vld [vmem:[%s3338_s13 + $0x18] sm:$0xff]  ;;  %v1534_v22 = vld [vmem:[%s3338_s13 + $0x30] sm:$0x1] }
 0x1f7   : > { %v981_v41 = vmax.f32 %v963_v33, 0.0  ;;  %v1529_v33 = vld [vmem:[%s3338_s13 + $0x8] sm:$0xff] }
 0x1f8   : > { %v982_v44 = vmax.f32 %v965_v36, 0.0  ;;  %v2333_v45 = vpop.f32.mrb[16].mxu1  ;;  %v2509_v36 = vpack.c.bf16 %v1453_v31, %v1452_v29  ;;  %v1712_v27 = vld [vmem:[%s3339_s14 + $0x88] sm:$0xff] }
 0x1f9   : > { %v1110_v46 = vadd.f32 %v2333_v45, %v2084_v37  ;;  %v1104_v47 = vpop.f32.mrb[17].mxu1  ;;  %v3053_v48 = vadd.f32 %v997_v39, %v981_v41  ;;  %v1528_v39 = vld [vmem:[%s3338_s13] sm:$0xff]  ;;  %v1530_v41 = vld [vmem:[%s3338_s13 + $0x10] sm:$0xff] }
 0x1fa   : > { %v1105_v15 = vadd.f32 %v2084_v37, %v1104_v47  ;;  %v3055_v49 = vadd.f32 %v998_v43, %v982_v44  ;;  %v1447_v43 = vld [vmem:[%s3340_s15] sm:$0x1]  ;;  %v2513_v44 = vpack.c.bf16 %v1530_v41, %v1528_v39  ;;  %v1697_v41 = vld [vmem:[%s3339_s14 + $0x10] sm:$0xff] }
 0x1fb   : > { %v1144_v53 = vmax.f32 %v1110_v46, 0.0  ;;  %v2085_v45 = vld [vmem:[%s3335_s10] ss:$0 sm:$0xff] }
 0x1fc   : > { %v1143_v16 = vmax.f32 %v1105_v15, 0.0  ;;  %v2336_v51 = vpop.f32.mrb[18].mxu1 }
 0x1fd   : > { %v1120_v54 = vadd.f32 %v2336_v51, %v2084_v37  ;;  %v1114_v57 = vpop.f32.mrb[19].mxu1 }
 0x1fe   : > { %v1115_v58 = vadd.f32 %v2084_v37, %v1114_v57  ;;  %2351 = vmatprep.mubr.msk.f32.mxu0 %vm1162_vm4, %v1143_v16 }
 0x1ff   : > { %v1146_v59 = vmax.f32 %v1120_v54, 0.0  ;;  %2352 = vmatmul.mubr.msk.f32.vlgmr.msra.gmra.mrb[8].mxu0 %vm1162_vm4, %v1144_v53 }
 0x200   : > { %v1145_v60 = vmax.f32 %v1115_v58, 0.0  ;;  %v2339_v63 = vpop.f32.mrb[20].mxu1  ;;  %2495 = vmatpush3.bf16.msra.mxu0 %v2968_v9  ;;  %v1306_v9 = vld [vmem:[%s3336_s11 + $0x10] sm:$0xff] }
 0x201   : > { %v1130_v1 = vadd.f32 %v2339_v63, %v2084_v37  ;;  %v1124_v5 = vpop.f32.mrb[21].mxu1  ;;  %v2496_v18 = vpack.c.bf16 %v1307_v14, %v1306_v9  ;;  %v1533_v14 = vld [vmem:[%s3338_s13 + $0x28] sm:$0xff] }
 0x202   : > { %2354 = vmatprep.mubr.msk.f32.mxu0 %vm1162_vm4, %v1145_v60  ;;  %v1125_v6 = vadd.f32 %v2084_v37, %v1124_v5 }
 0x203   : > { %v1148_v8 = vmax.f32 %v1130_v1, 0.0  ;;  %2355 = vmatmul.mubr.msk.f32.gmra.mrb[10].mxu0 %vm1162_vm4, %v1146_v59  ;;  %2498 = vmatprep.subr.msk.bf16.mxu0 %vm2950_vm3, %v2496_v18 }
 0x204   : > { %v1147_v19 = vmax.f32 %v1125_v6, 0.0  ;;  %v2342_v55 = vpop.f32.mrb[22].mxu1  ;;  %2501 = vmatpush3.bf16.msk.msra.mxu0 %vm2950_vm3, %v2496_v18  ;;  %v1535_v18 = vld [vmem:[%s3338_s13 + $0x38] sm:$0x1] }
 0x205   : > { %v1140_v56 = vadd.f32 %v2342_v55, %v2084_v37  ;;  %v1134_v61 = vpop.f32.mrb[23].mxu1  ;;  %v2515_v20 = vpack.c.bf16 %v1535_v18, %v1533_v14 }
 0x206   : > { %2357 = vmatprep.mubr.msk.f32.mxu1 %vm1162_vm4, %v1147_v19  ;;  %v1135_v4 = vadd.f32 %v2084_v37, %v1134_v61  ;;  %v2511_v37 = vpack.c.bf16 %v1531_v34, %v1529_v33  ;;  %v1713_v33 = vld [vmem:[%s3339_s14 + $0x90] sm:$0xff]  ;;  %v1714_v34 = vld [vmem:[%s3339_s14 + $0x98] sm:$0xff] }
 0x207   : > { %2358 = vmatmul.mubr.msk.f32.vlgmr.msra.gmra.mrb[24].mxu1 %vm1162_vm4, %v1148_v8  ;;  %v1150_v10 = vmax.f32 %v1140_v56, 0.0  ;;  %v2525_v39 = vpack.c.bf16 %v1714_v34, %v1713_v33 }
 0x208   : > { %v1149_v13 = vmax.f32 %v1135_v4, 0.0  ;;  %2504 = vmatpush3.bf16.msra.mxu1 %v2503_v26  ;;  %v1711_v26 = vld [vmem:[%s3339_s14 + $0x80] sm:$0xff] }
 0x209   : > { %2505 = vmatprep.subr.bf16.mxu1 %v2579_v24  ;;  %v2521_v31 = vpack.c.bf16 %v1712_v27, %v1711_v26 }
 0x20a   : > { %2360 = vmatprep.mubr.msk.f32.mxu1 %vm1162_vm4, %v1149_v13 }
 0x20b   : > { %2361 = vmatmul.mubr.msk.f32.gmra.mrb[26].mxu1 %vm1162_vm4, %v1150_v10  ;;  %2522 = vmatprep.subr.bf16.mxu0 %v2521_v31 }
 0x20c   : > { %2395 = vmatprep.mubr.msk.f32.mxu1 %vm2580_vm5, %v2577_v17  ;;  %2507 = vmatpush3.bf16.msra.mxu1 %v2506_v28  ;;  %v1695_v28 = vld [vmem:[%s3339_s14] sm:$0xff] }
 0x20d   : > { %2508 = vmatprep.subr.bf16.mxu1 %v2579_v24  ;;  %v2518_v24 = vpack.c.bf16 %v1534_v22, %v1532_v21  ;;  %v1708_v21 = vld [vmem:[%s3339_s14 + $0x68] sm:$0xff] }
 0x210   : > { %2510 = vmatpush3.bf16.msra.mxu1 %v2509_v36 }
 0x211   : > { %2512 = vmatprep.subr.bf16.mxu1 %v2511_v37  ;;  %v2523_v37 = vpack.c.bf16 %v1696_v3, %v1695_v28 }
 0x213   : > { %2396 = vmatmul.mubr.msk.f32.vlgmr.msra.gmra.mrb[28].mxu1 %vm1454_vm6, %v1447_v43  ;;  %v1698_v43 = vld [vmem:[%s3339_s14 + $0x18] sm:$0xff] }
 0x214   : > { %2514 = vmatpush1.bf16.msra.mxu1 %v2513_v44  ;;  %1630 = vmatprep.mubr.f32.mxu1 %v2577_v17  ;;  %v1715_v44 = vld [vmem:[%s3339_s14 + $0xa0] sm:$0xff] }
 0x215   : > { %2517 = vmatprep.subr.msk.bf16.mxu1 %vm2950_vm3, %v2515_v20  ;;  %v1707_v20 = vld [vmem:[%s3339_s14 + $0x60] sm:$0xff] }
 0x216   : > { %v2547_v22 = vpack.c.bf16 %v1708_v21, %v1707_v20 }
 0x218   : > { %2520 = vmatpush1.bf16.msk.msra.mxu1 %vm2950_vm3, %v2518_v24  ;;  %v2095_v24 = vld [vmem:[%s3337_s12] ss:$0 sm:$0xff] }
 0x2d2   : > { %v2353_v46 = vpop.f32.mrb[8].mxu0 }
 0x2d3   : > { %v1263_v47 = vadd.f32 %v2353_v46, %v2085_v45  ;;  %v1257_v15 = vpop.f32.mrb[9].mxu0  ;;  %v2527_v46 = vpack.c.bf16 %v1698_v43, %v1697_v41 }
 0x2d4   : > { %v1258_v16 = vadd.f32 %v2085_v45, %v1257_v15  ;;  %v1699_v15 = vld [vmem:[%s3339_s14 + $0x20] sm:$0xff] }
 0x2d5   : > { %v1297_v54 = vmax.f32 %v1263_v47, 0.0 }
 0x2d6   : > { %v1296_v51 = vmax.f32 %v1258_v16, 0.0  ;;  %v2356_v53 = vpop.f32.mrb[10].mxu0  ;;  %v1700_v16 = vld [vmem:[%s3339_s14 + $0x28] sm:$0xff] }
 0x2d7   : > { %v1273_v57 = vadd.f32 %v2356_v53, %v2085_v45  ;;  %v1267_v58 = vpop.f32.mrb[11].mxu0  ;;  %v1718_v53 = vld [vmem:[%s3339_s14 + $0xb8] sm:$0xff] }
 0x2d8   : > { %v1268_v59 = vadd.f32 %v2085_v45, %v1267_v58  ;;  %2371 = vmatprep.mubr.msk.f32.mxu0 %vm1162_vm4, %v1296_v51  ;;  %v1717_v51 = vld [vmem:[%s3339_s14 + $0xb0] sm:$0xff] }
 0x2d9   : > { %v1299_v60 = vmax.f32 %v1273_v57, 0.0  ;;  %2372 = vmatmul.mubr.msk.f32.vlgmr.msra.gmra.mrb[12].mxu0 %vm1162_vm4, %v1297_v54  ;;  %v2531_v54 = vpack.c.bf16 %v1700_v16, %v1699_v15  ;;  %v2533_v57 = vpack.c.bf16 %v1718_v53, %v1717_v51  ;;  %v1701_v58 = vld [vmem:[%s3339_s14 + $0x30] sm:$0xff]  ;;  %v1726_v16 = vld [vmem:[%s3339_s14 + $0xf8] sm:$0xff] }
 0x2da   : > { %v1298_v63 = vmax.f32 %v1268_v59, 0.0  ;;  %v2359_v1 = vpop.f32.mrb[24].mxu1  ;;  %2524 = vmatpush3.bf16.msra.mxu0 %v2523_v37  ;;  %v1702_v59 = vld [vmem:[%s3339_s14 + $0x38] sm:$0xff]  ;;  %v1725_v15 = vld [vmem:[%s3339_s14 + $0xf0] sm:$0xff] }
 0x2db   : > { %v1283_v5 = vadd.f32 %v2359_v1, %v2085_v45  ;;  %v1277_v6 = vpop.f32.mrb[25].mxu1  ;;  %2526 = vmatprep.subr.bf16.mxu0 %v2525_v39  ;;  %v2535_v1 = vpack.c.bf16 %v1702_v59, %v1701_v58  ;;  %v2549_v51 = vpack.c.bf16 %v1726_v16, %v1725_v15  ;;  %v1709_v53 = vld [vmem:[%s3339_s14 + $0x70] sm:$0xff] }
 0x2dc   : > { %2374 = vmatprep.mubr.msk.f32.mxu0 %vm1162_vm4, %v1298_v63  ;;  %v1278_v8 = vadd.f32 %v2085_v45, %v1277_v6  ;;  %v1720_v63 = vld [vmem:[%s3339_s14 + $0xc8] sm:$0xff]  ;;  %v1703_v6 = vld [vmem:[%s3339_s14 + $0x40] sm:$0xff] }
 0x2dd   : > { %v1301_v19 = vmax.f32 %v1283_v5, 0.0  ;;  %2375 = vmatmul.mubr.msk.f32.gmra.mrb[14].mxu0 %vm1162_vm4, %v1299_v60  ;;  %v1719_v60 = vld [vmem:[%s3339_s14 + $0xc0] sm:$0xff] }
 0x2de   : > { %v1300_v55 = vmax.f32 %v1278_v8, 0.0  ;;  %v2362_v56 = vpop.f32.mrb[26].mxu1  ;;  %2528 = vmatpush3.bf16.msra.mxu0 %v2527_v46  ;;  %v2537_v5 = vpack.c.bf16 %v1720_v63, %v1719_v60  ;;  %v1704_v8 = vld [vmem:[%s3339_s14 + $0x48] sm:$0xff] }
 0x2df   : > { %v1293_v61 = vadd.f32 %v2362_v56, %v2085_v45  ;;  %v1287_v4 = vpop.f32.mrb[27].mxu1  ;;  %v2539_v56 = vpack.c.bf16 %v1704_v8, %v1703_v6 }
 0x2e0   : > { %2377 = vmatprep.mubr.msk.f32.mxu0 %vm1162_vm4, %v1300_v55  ;;  %v1288_v10 = vadd.f32 %v2085_v45, %v1287_v4  ;;  %v1716_v45 = vld [vmem:[%s3339_s14 + $0xa8] sm:$0xff]  ;;  %v1722_v55 = vld [vmem:[%s3339_s14 + $0xd8] sm:$0xff]  ;;  %v1705_v4 = vld [vmem:[%s3339_s14 + $0x50] sm:$0xff] }
 0x2e1   : > { %2378 = vmatmul.mubr.msk.f32.gmra.mrb[16].mxu0 %vm1162_vm4, %v1301_v19  ;;  %v1303_v13 = vmax.f32 %v1293_v61, 0.0  ;;  %v2529_v47 = vpack.c.bf16 %v1716_v45, %v1715_v44  ;;  %v1721_v19 = vld [vmem:[%s3339_s14 + $0xd0] sm:$0xff] }
 0x2e2   : > { %v1302_v9 = vmax.f32 %v1288_v10, 0.0  ;;  %v2541_v61 = vpack.c.bf16 %v1722_v55, %v1721_v19  ;;  %v1706_v10 = vld [vmem:[%s3339_s14 + $0x58] sm:$0xff] }
 0x2e3   : > { %2530 = vmatprep.subr.bf16.mxu0 %v2529_v47  ;;  %v2543_v14 = vpack.c.bf16 %v1706_v10, %v1705_v4 }
 0x2e4   : > { %2380 = vmatprep.mubr.msk.f32.mxu0 %vm1162_vm4, %v1302_v9  ;;  %2532 = vmatpush3.bf16.msra.mxu0 %v2531_v54  ;;  %v1724_v9 = vld [vmem:[%s3339_s14 + $0xe8] sm:$0xff] }
 0x2e5   : > { %2381 = vmatmul.mubr.msk.f32.gmra.mrb[18].mxu0 %vm1162_vm4, %v1303_v13  ;;  %2534 = vmatprep.subr.bf16.mxu0 %v2533_v57  ;;  %v1723_v13 = vld [vmem:[%s3339_s14 + $0xe0] sm:$0xff] }
 0x2e6   : > { %v3147_v29 = vpop.f32.mrb[28].mxu1  ;;  %v2545_v18 = vpack.c.bf16 %v1724_v9, %v1723_v13 }
 0x2e7   : > { %v2397_v36 = vpop.f32.mrb[29].mxu1 }
 0x2e8   : > { %2536 = vmatpush3.bf16.msra.mxu0 %v2535_v1 }
 0x2e9   : > { %2538 = vmatprep.subr.bf16.mxu0 %v2537_v5 }
 0x2ec   : > { %2540 = vmatpush3.bf16.msra.mxu0 %v2539_v56 }
 0x2ed   : > { %2542 = vmatprep.subr.bf16.mxu0 %v2541_v61 }
 0x2f0   : > { %2544 = vmatpush3.bf16.msra.mxu0 %v2543_v14 }
 0x2f1   : > { %2546 = vmatprep.subr.bf16.mxu0 %v2545_v18 }
 0x2f4   : > { %2548 = vmatpush3.bf16.msra.mxu0 %v2547_v22  ;;  %v3271_v22 = vstv %s2116_s20 }
 0x2f5   : > { %2550 = vmatprep.subr.bf16.mxu0 %v2549_v51 }
 0x3ac   : > { %v2373_v26 = vpop.f32.mrb[12].mxu0 }
 0x3ad   : > { %v1408_v27 = vpop.f32.mrb[13].mxu0  ;;  %v1414_v33 = vadd.f32 %v2373_v26, %v2095_v24  ;;  %v1871_v26 = vadd.s32 %v3271_v22, %v2971_v11 }
 0x3ae   : > { %v1409_v28 = vadd.f32 %v2095_v24, %v1408_v27 }
 0x3af   : > { %vm1879_vm7 = vcmp.lt.s32.totalorder %v1871_v26, 240 }
 0x3b0   : > { %v2376_v31 = vpop.f32.mrb[14].mxu0  ;;  %2108 = vmatmul.mubr.msk.f32.vlgmr.msra.gmra.mrb[30].mxu1 %vm1162_vm4, %v1409_v28  ;;  %v1863_v28 = vadd.s32 16, %v2971_v11 }
 0x3b1   : > { %v1418_v3 = vpop.f32.mrb[15].mxu0  ;;  %1636 = vmatprep.mubr.f32.mxu1 %v2577_v17  ;;  %v1424_v43 = vadd.f32 %v2376_v31, %v2095_v24 }
 0x3b2   : > { %v1419_v37 = vadd.f32 %v2095_v24, %v1418_v3 }
 0x3b4   : > { %2109 = vmatmul.mubr.msk.f32.gmra.mrb[32].mxu1 %vm1162_vm4, %v1414_v33  ;;  %v2379_v34 = vpop.f32.mrb[16].mxu0 }
 0x3b5   : > { %1642 = vmatprep.mubr.f32.mxu1 %v2577_v17  ;;  %v1428_v36 = vpop.f32.mrb[17].mxu0  ;;  %v1434_v45 = vadd.f32 %v2379_v34, %v2095_v24 }
 0x3b6   : > { %v1429_v44 = vadd.f32 %v2095_v24, %v1428_v36  ;;  %v1873_v36 = vadd.s32 %v3271_v22, %v1863_v28 }
 0x3b8   : > { %2110 = vmatmul.mubr.msk.f32.gmra.mrb[34].mxu1 %vm1162_vm4, %v1419_v37  ;;  %v2382_v39 = vpop.f32.mrb[18].mxu0  ;;  %v1864_v37 = vadd.s32 24, %v2971_v11  ;;  %vm1881_vm9 = vcmp.lt.s32.totalorder %v1873_v36, 240 }
 0x3b9   : > { %1648 = vmatprep.mubr.f32.mxu1 %v2577_v17  ;;  %v1438_v41 = vpop.f32.mrb[19].mxu0  ;;  %v1444_v47 = vadd.f32 %v2382_v39, %v2095_v24 }
 0x3ba   : > { %v1439_v46 = vadd.f32 %v2095_v24, %v1438_v41  ;;  %v1862_v24 = vadd.s32 8, %v2971_v11  ;;  %v1874_v15 = vadd.s32 %v3271_v22, %v1864_v37 }
 0x3bc   : > { %2111 = vmatmul.mubr.msk.f32.gmra.mrb[36].mxu1 %vm1162_vm4, %v1424_v43  ;;  %vm1882_vm10 = vcmp.lt.s32.totalorder %v1874_v15, 240 }
 0x3bd   : > { %1654 = vmatprep.mubr.f32.mxu1 %v2577_v17 }
 0x3c0   : > { %2112 = vmatmul.mubr.msk.f32.gmra.mrb[38].mxu1 %vm1162_vm4, %v1429_v44 }
 0x3c1   : > { %1660 = vmatprep.mubr.f32.mxu1 %v2577_v17 }
 0x3c4   : > { %2113 = vmatmul.mubr.msk.f32.gmra.mrb[40].mxu1 %vm1162_vm4, %v1434_v45 }
 0x3c5   : > { %1666 = vmatprep.mubr.f32.mxu1 %v2577_v17 }
 0x3c8   : > { %2114 = vmatmul.mubr.msk.f32.gmra.mrb[42].mxu1 %vm1162_vm4, %v1439_v46 }
 0x3c9   : > { %1672 = vmatprep.mubr.f32.mxu1 %v2577_v17  ;;  %v1710_v17 = vld [vmem:[%s3339_s14 + $0x78] sm:$0xff] }
 0x3ca   : > { %v2551_v54 = vpack.c.bf16 %v1710_v17, %v1709_v53 }
 0x3cc   : > { %2115 = vmatmul.mubr.msk.f32.gmra.mrb[44].mxu1 %vm1162_vm4, %v1444_v47  ;;  %2552 = vmatpush3.bf16.msra.mxu0 %v2551_v54  ;;  %v1865_v54 = vadd.s32 32, %v2971_v11 }
 0x483   : > { %v1632_v57 = vpop.f32.mrb[30].mxu1 }
 0x484   : > { %v1679_v58 = vmul.f32 %v1632_v57, %v2995_v30  ;;  %v1634_v59 = vpop.f32.mrb[31].mxu1 }
 0x485   : > { %v1680_v60 = vmul.f32 %v1634_v59, %v2998_v32 }
 0x487   : > { %v1638_v63 = vpop.f32.mrb[32].mxu1  ;;  %1791 = vmatprep.mubr.f32.mxu0 %v1680_v60 }
 0x488   : > { %v1681_v1 = vmul.f32 %v1638_v63, %v3003_v40  ;;  %v1640_v5 = vpop.f32.mrb[33].mxu1  ;;  %1792 = vmatmul.mubr.f32.vlgmr.msra.gmra.mrb[20].mxu0 %v1679_v58 }
 0x489   : > { %v1682_v6 = vmul.f32 %v1640_v5, %v3006_v42  ;;  %v1866_v5 = vadd.s32 40, %v2971_v11 }
 0x48b   : > { %v1644_v8 = vpop.f32.mrb[34].mxu1  ;;  %1796 = vmatprep.mubr.f32.mxu0 %v1682_v6 }
 0x48c   : > { %v1683_v19 = vmul.f32 %v1644_v8, %v3011_v50  ;;  %v1646_v55 = vpop.f32.mrb[35].mxu1  ;;  %1797 = vmatmul.mubr.f32.gmra.mrb[22].mxu0 %v1681_v1 }
 0x48d   : > { %v1684_v56 = vmul.f32 %v1646_v55, %v3014_v52  ;;  %v1875_v55 = vadd.s32 %v3271_v22, %v1865_v54 }
 0x48f   : > { %v1650_v30 = vpop.f32.mrb[36].mxu1  ;;  %1801 = vmatprep.mubr.f32.mxu0 %v1684_v56  ;;  %vm1883_vm11 = vcmp.lt.s32.totalorder %v1875_v55, 240 }
 0x490   : > { %v1685_v32 = vmul.f32 %v1650_v30, %v3019_v0  ;;  %v1652_v61 = vpop.f32.mrb[37].mxu1  ;;  %1802 = vmatmul.mubr.f32.gmra.mrb[24].mxu0 %v1683_v19 }
 0x491   : > { %v1686_v40 = vmul.f32 %v1652_v61, %v3022_v2 }
 0x493   : > { %v1656_v4 = vpop.f32.mrb[38].mxu1  ;;  %1806 = vmatprep.mubr.f32.mxu0 %v1686_v40 }
 0x494   : > { %v1687_v42 = vmul.f32 %v1656_v4, %v3027_v62  ;;  %v1658_v10 = vpop.f32.mrb[39].mxu1  ;;  %1807 = vmatmul.mubr.f32.gmra.mrb[26].mxu0 %v1685_v32 }
 0x495   : > { %v1688_v50 = vmul.f32 %v1658_v10, %v3030_v7 }
 0x497   : > { %v1662_v13 = vpop.f32.mrb[40].mxu1  ;;  %1811 = vmatprep.mubr.f32.mxu0 %v1688_v50 }
 0x498   : > { %v1689_v52 = vmul.f32 %v1662_v13, %v3035_v23  ;;  %v1664_v9 = vpop.f32.mrb[41].mxu1  ;;  %1812 = vmatmul.mubr.f32.gmra.mrb[28].mxu0 %v1687_v42  ;;  %v1876_v42 = vadd.s32 %v3271_v22, %v1866_v5 }
 0x499   : > { %v1690_v0 = vmul.f32 %v1664_v9, %v3038_v25 }
 0x49a   : > { %vm1884_vm12 = vcmp.lt.s32.totalorder %v1876_v42, 240 }
 0x49b   : > { %v1668_v14 = vpop.f32.mrb[42].mxu1  ;;  %1816 = vmatprep.mubr.f32.mxu0 %v1690_v0 }
 0x49c   : > { %v1691_v2 = vmul.f32 %v1668_v14, %v3043_v35  ;;  %v1670_v18 = vpop.f32.mrb[43].mxu1  ;;  %1817 = vmatmul.mubr.f32.gmra.mrb[30].mxu0 %v1689_v52  ;;  %v1867_v52 = vadd.s32 48, %v2971_v11 }
 0x49d   : > { %v1692_v62 = vmul.f32 %v1670_v18, %v3049_v38  ;;  %v3277_v38 = vrot.slane %v3147_v29, %v821_v12  ;;  %v1872_v12 = vadd.s32 %v3271_v22, %v1862_v24 }
 0x49f   : > { %v1674_v20 = vpop.f32.mrb[44].mxu1  ;;  %1821 = vmatprep.mubr.f32.mxu0 %v1692_v62  ;;  %vm1880_vm8 = vcmp.lt.s32.totalorder %v1872_v12, 240 }
 0x4a0   : > { %v1693_v7 = vmul.f32 %v1674_v20, %v3053_v48  ;;  %v1676_v21 = vpop.f32.mrb[45].mxu1  ;;  %1822 = vmatmul.mubr.f32.gmra.mrb[32].mxu0 %v1691_v2 }
 0x4a1   : > { %v1694_v23 = vmul.f32 %v1676_v21, %v3055_v49 }
 0x4a3   : > { %1826 = vmatprep.mubr.f32.mxu0 %v1694_v23  ;;  %v1877_v23 = vadd.s32 %v3271_v22, %v1867_v52 }
 0x4a4   : > { %1827 = vmatmul.mubr.f32.gmra.mrb[34].mxu0 %v1693_v7 }
 0x4a5   : > { %vm1885_vm13 = vcmp.lt.s32.totalorder %v1877_v23, 240 }
 0x55b   : > { %v2231_v25 = vpop.f32.mrb[20].mxu0 }
 0x55c   : > { %v2232_v35 = vpop.f32.mrb[21].mxu0 }
 0x55d   : > { %v2233_v48 = vadd.f32 %v2232_v35, %v2231_v25  ;;  %v1868_v25 = vadd.s32 56, %v2971_v11 }
 0x55f   : > { %v1836_v49 = vadd.f32 %v2233_v48, %v3277_v38  ;;  %v2234_v27 = vpop.f32.mrb[22].mxu0 }
 0x560   : > { %v2235_v31 = vpop.f32.mrb[23].mxu0 }
 0x561   : > { %v1844_v29 = vmax.f32 %v1836_v49, 0.0  ;;  %v2236_v3 = vadd.f32 %v2235_v31, %v2234_v27 }
 0x563   : > { %1852 = vst [vmem:[%s3287_s18] sm:$0xff] %v1844_v29  ;;  %v1837_v33 = vadd.f32 %v2236_v3, %v3277_v38  ;;  %v2237_v34 = vpop.f32.mrb[24].mxu0  ;;  %v1903_v41 = vsel %vm1879_vm7, %v1844_v29, 0.0  ;;  %v1878_v29 = vadd.s32 %v3271_v22, %v1868_v25 }
 0x564   : > { %v2238_v39 = vpop.f32.mrb[25].mxu0  ;;  %v1924_v16 = vmul.f32 %v1903_v41, %v1903_v41 }
 0x565   : > { %v1845_v43 = vmax.f32 %v1837_v33, 0.0  ;;  %v2239_v44 = vadd.f32 %v2238_v39, %v2237_v34  ;;  %vm1886_vm14 = vcmp.lt.s32.totalorder %v1878_v29, 240 }
 0x567   : > { %1853 = vst [vmem:[%s3287_s18 + $0x8] sm:$0xff] %v1845_v43  ;;  %v1904_v45 = vsel %vm1880_vm8, %v1845_v43, 0.0  ;;  %v1838_v46 = vadd.f32 %v2239_v44, %v3277_v38  ;;  %v2240_v47 = vpop.f32.mrb[26].mxu0 }
 0x568   : > { %v1911_v51 = vadd.f32 %v1904_v45, %v1903_v41  ;;  %v1925_v53 = vmul.f32 %v1904_v45, %v1904_v45  ;;  %v2241_v17 = vpop.f32.mrb[27].mxu0 }
 0x569   : > { %v1846_v57 = vmax.f32 %v1838_v46, 0.0  ;;  %v2242_v58 = vadd.f32 %v2241_v17, %v2240_v47 }
 0x56a   : > { %v1932_v59 = vadd.f32 %v1925_v53, %v1924_v16 }
 0x56b   : > { %1854 = vst [vmem:[%s3287_s18 + $0x10] sm:$0xff] %v1846_v57  ;;  %v1905_v60 = vsel %vm1881_vm9, %v1846_v57, 0.0  ;;  %v1839_v63 = vadd.f32 %v2242_v58, %v3277_v38  ;;  %v2243_v1 = vpop.f32.mrb[28].mxu0 }
 0x56c   : > { %v1912_v6 = vadd.f32 %v1911_v51, %v1905_v60  ;;  %v1926_v8 = vmul.f32 %v1905_v60, %v1905_v60  ;;  %v2244_v19 = vpop.f32.mrb[29].mxu0 }
 0x56d   : > { %v1847_v56 = vmax.f32 %v1839_v63, 0.0  ;;  %v2245_v30 = vadd.f32 %v2244_v19, %v2243_v1 }
 0x56e   : > { %v1933_v32 = vadd.f32 %v1932_v59, %v1926_v8 }
 0x56f   : > { %1855 = vst [vmem:[%s3287_s18 + $0x18] sm:$0xff] %v1847_v56  ;;  %v1906_v61 = vsel %vm1882_vm10, %v1847_v56, 0.0  ;;  %v1840_v40 = vadd.f32 %v2245_v30, %v3277_v38  ;;  %v2246_v4 = vpop.f32.mrb[30].mxu0 }
 0x570   : > { %v1913_v10 = vadd.f32 %v1912_v6, %v1906_v61  ;;  %v1927_v50 = vmul.f32 %v1906_v61, %v1906_v61  ;;  %v2247_v13 = vpop.f32.mrb[31].mxu0 }
 0x571   : > { %v1848_v9 = vmax.f32 %v1840_v40, 0.0  ;;  %v2248_v0 = vadd.f32 %v2247_v13, %v2246_v4 }
 0x572   : > { %v1934_v14 = vadd.f32 %v1933_v32, %v1927_v50 }
 0x573   : > { %1856 = vst [vmem:[%s3287_s18 + $0x20] sm:$0xff] %v1848_v9  ;;  %v1907_v2 = vsel %vm1883_vm11, %v1848_v9, 0.0  ;;  %v1841_v18 = vadd.f32 %v2248_v0, %v3277_v38  ;;  %v2249_v62 = vpop.f32.mrb[32].mxu0 }
 0x574   : > { %v1914_v20 = vadd.f32 %v1913_v10, %v1907_v2  ;;  %v1928_v7 = vmul.f32 %v1907_v2, %v1907_v2  ;;  %v2250_v21 = vpop.f32.mrb[33].mxu0 }
 0x575   : > { %v1849_v35 = vmax.f32 %v1841_v18, 0.0  ;;  %v2251_v24 = vadd.f32 %v2250_v21, %v2249_v62 }
 0x576   : > { %v1935_v48 = vadd.f32 %v1934_v14, %v1928_v7 }
 0x577   : > { %1857 = vst [vmem:[%s3287_s18 + $0x28] sm:$0xff] %v1849_v35  ;;  %v1908_v26 = vsel %vm1884_vm12, %v1849_v35, 0.0  ;;  %v1842_v49 = vadd.f32 %v2251_v24, %v3277_v38  ;;  %v2252_v27 = vpop.f32.mrb[34].mxu0 }
 0x578   : > { %v1915_v28 = vadd.f32 %v1914_v20, %v1908_v26  ;;  %v1929_v31 = vmul.f32 %v1908_v26, %v1908_v26  ;;  %v2253_v12 = vpop.f32.mrb[35].mxu0 }
 0x579   : > { %v1850_v3 = vmax.f32 %v1842_v49, 0.0  ;;  %v2254_v33 = vadd.f32 %v2253_v12, %v2252_v27 }
 0x57a   : > { %v1936_v11 = vadd.f32 %v1935_v48, %v1929_v31 }
 0x57b   : > { %1858 = vst [vmem:[%s3287_s18 + $0x30] sm:$0xff] %v1850_v3  ;;  %v1909_v34 = vsel %vm1885_vm13, %v1850_v3, 0.0  ;;  %v1843_v36 = vadd.f32 %v2254_v33, %v3277_v38 }
 0x57c   : > { %v1916_v37 = vadd.f32 %v1915_v28, %v1909_v34  ;;  %v1930_v39 = vmul.f32 %v1909_v34, %v1909_v34 }
 0x57d   : > { %v1851_v41 = vmax.f32 %v1843_v36, 0.0 }
 0x57e   : > { %v1937_v43 = vadd.f32 %v1936_v11, %v1930_v39 }
 0x57f   : > { %1859 = vst [vmem:[%s3287_s18 + $0x38] sm:$0xff] %v1851_v41  ;;  %v1910_v44 = vsel %vm1886_vm14, %v1851_v41, 0.0 }
 0x580   : > { %v1917_v45 = vadd.f32 %v1916_v37, %v1910_v44  ;;  %v1931_v46 = vmul.f32 %v1910_v44, %v1910_v44 }
 0x582   : > { %v1918_v47 = vrot.slane %v1917_v45, 4  ;;  %v1938_v22 = vadd.f32 %v1937_v43, %v1931_v46 }
 0x584   : > { %v1919_v15 = vadd.f32 %v1918_v47, %v1917_v45  ;;  %v1939_v16 = vrot.slane %v1938_v22, 4 }
 0x586   : > { %v1920_v51 = vrot.slane %v1919_v15, 2  ;;  %v1940_v53 = vadd.f32 %v1939_v16, %v1938_v22 }
 0x588   : > { %v1921_v17 = vadd.f32 %v1920_v51, %v1919_v15  ;;  %v1941_v38 = vrot.slane %v1940_v53, 2 }
 0x58a   : > { %v1922_v54 = vrot.slane %v1921_v17, 1  ;;  %v1942_v57 = vadd.f32 %v1941_v38, %v1940_v53 }
 0x58c   : > { %v1943_v58 = vrot.slane %v1942_v57, 1  ;;  %v1923_v59 = vadd.f32 %v1922_v54, %v1921_v17 }
 0x58e   : > { %v1944_v60 = vadd.f32 %v1943_v58, %v1942_v57 }
 0x590   : > { %v1945_v63 = vsel %vm1187_vm1, %v1923_v59, %v1944_v60 }
 0x591   : > { %v1947_v1 = vsel %vm1946_vm15, %v1945_v63, 0.0 }
 0x592   : > { %1948 = vst [vmem:[%s636_s23] sm:$0xff] %v1947_v1 }
 0x593 PF: > { %s3356_s21 = sld [smem:[#allocation2_spill]] }
 0x599   : > { %s29_s27 = sadd.s32 1, %s3356_s21  }
 0x59a   : > { %p26_p5 = scmp.ge.s32.totalorder %s29_s27, 6  }
 0x59c   :  { %28 = sbr.rel (!%p26_p5) target bundleno = 5 (0x5), region = 136 }

</bundles_post_ra>
